<compile_context>
chip_gen: v5e
topology: v5e:2x2
jax: 0.10.0
libtpu: 0.0.40
codegen_flags: <defaults>
</compile_context>

<pallas_src>
import functools

import jax
import jax.numpy as jnp
from jax.experimental import pallas as pl
from jax.experimental.pallas import tpu as pltpu


# ------------------------------- Pallas kernel -------------------------------


def _down_block_kernel(*refs, pool, pad):
    """Fused AvgPool2x2 + 3x (conv3x3 + bias + ReLU) for a block of B_t images.

    Scratch layout: 2-D, rows = B_t * (H_layer + 2*pad) stacked per image
    (pad rows zeroed), lanes = W_layer * C_layer.  Each conv layer is 3 banded
    MXU matmuls whose M dimension covers the whole batch-block at once; the 2
    seam rows per image boundary are garbage and are never copied forward.
    """
    if pool:
        (hp_ref, x_ref, w1_ref, w2_ref, w3_ref,
         b1_ref, b2_ref, b3_ref, o_ref, scr_ref) = refs
    else:
        (x_ref, w1_ref, w2_ref, w3_ref,
         b1_ref, b2_ref, b3_ref, o_ref, scr_ref) = refs
    p = pad
    bt = x_ref.shape[0]
    h0 = hp_ref.shape[0] if pool else x_ref.shape[1]

    def store_padded(b, y_b, h_in, k):
        """Write image b's (h_in, k) layer input into its padded scratch window."""
        hp = h_in + 2 * p
        base = b * hp
        if p > 0:                               # re-zero this layer's pad rows
            zp = jnp.zeros((p, k), jnp.float32)
            scr_ref[base:base + p, :k] = zp
            scr_ref[base + p + h_in:base + hp, :k] = zp
        scr_ref[base + p:base + p + h_in, :k] = y_b

    def conv_relu(h_in, w_ref, brow_ref):
        """conv3x3 + bias + ReLU over the whole batch-block in one M-folded pass."""
        k, n = w_ref.shape[1], w_ref.shape[2]
        hp = h_in + 2 * p
        m = bt * hp - 2                         # includes 2 junk rows per image seam
        # Hoisted cast: load the padded window once, cast once; the dy taps below
        # are sublane-shifted value slices of this single casted array.
        xw = scr_ref[:bt * hp, :k].astype(w_ref.dtype)
        acc = jnp.broadcast_to(brow_ref[...], (m, n))        # bias-initialised f32 acc
        for dy in range(3):                     # 3 banded MXU matmuls (dx taps folded)
            acc = acc + jnp.dot(xw[dy:dy + m, :], w_ref[dy],
                                preferred_element_type=jnp.float32)
        return jnp.maximum(acc, 0.0), h_in + 2 * p - 2, hp   # fused ReLU

    # ---- stage 0: (optionally H-pooled) input -> padded scratch ----------------
    k1 = w1_ref.shape[1]
    if pool:
        hpool = hp_ref[...]                     # (H/2, H) f32 pooling matrix
        for b in range(bt):                     # static loop, tiny per-image matmul
            pooled = jnp.dot(hpool, x_ref[b].astype(jnp.float32),
                             preferred_element_type=jnp.float32)
            store_padded(b, pooled, h0, k1)
    else:
        xv = x_ref[...].astype(jnp.float32)
        for b in range(bt):
            store_padded(b, xv[b], h0, k1)

    # ---- layers 1 & 2: conv+ReLU, write back into the padded scratch -----------
    h_in = h0
    for w_ref, brow_ref in ((w1_ref, b1_ref), (w2_ref, b2_ref)):
        y, h_out, hp_prev = conv_relu(h_in, w_ref, brow_ref)
        n = w_ref.shape[2]
        for b in range(bt):                     # drop the 2 junk seam rows per image
            store_padded(b, y[b * hp_prev:b * hp_prev + h_out, :], h_out, n)
        h_in = h_out

    # ---- layer 3: conv+ReLU, lane-dense store straight to the output block -----
    y, h_out, hp_prev = conv_relu(h_in, w3_ref, b3_ref)
    for b in range(bt):
        o_ref[b] = y[b * hp_prev:b * hp_prev + h_out, :].astype(o_ref.dtype)


# --------------------------- weight / pool packing ---------------------------


def _pack_band(w, w_in, pad, dtype):
    """Banded matrix per dy tap: folds the 3 dx taps + W zero padding.

    B[dy][win*Ci + c, wout*Co + o] = w[dy, dx, c, o] where win == wout + dx - pad
    (zero elsewhere; out-of-range columns implement the zero padding).
    """
    kh, kw, ci, co = w.shape
    w_out = w_in + 2 * pad - (kw - 1)
    win = jnp.arange(w_in)[:, None]
    wout = jnp.arange(w_out)[None, :]
    sel = jnp.stack([(win == wout + dx - pad) for dx in range(kw)], axis=0)
    sel = sel.astype(w.dtype)                                  # (kw, w_in, w_out)
    band = jnp.einsum('dxw,kdco->kxcwo', sel, w)               # (kh,w_in,ci,w_out,co)
    return band.reshape(kh, w_in * ci, w_out * co).astype(dtype)


def _pack_band_pooled(w, w_unpooled, pad, dtype):
    """Band for conv #1 with the W-direction half of the 2x2 avg pool folded in.

    The LHS lanes index the *unpooled* width: lane = win*Ci + c.
    """
    kh, kw, ci, co = w.shape
    w_pooled = w_unpooled // 2
    w_out = w_pooled + 2 * pad - (kw - 1)
    win = jnp.arange(w_unpooled)[:, None]
    wout = jnp.arange(w_out)[None, :]
    sel = []
    for dx in range(kw):
        pc = wout + dx - pad                   # pooled column read by this tap
        hit = (win // 2 == pc) & (pc >= 0) & (pc < w_pooled)
        sel.append(jnp.where(hit, 0.5, 0.0))   # 0.5 = W half of the 2x2 mean
    sel = jnp.stack(sel, axis=0).astype(w.dtype)
    band = jnp.einsum('dxw,kdco->kxcwo', sel, w)
    return band.reshape(kh, w_unpooled * ci, w_out * co).astype(dtype)


def _pack_hpool(h, dtype):
    """(h//2, h) matrix with 0.5 at (j, 2j) and (j, 2j+1): H half of the pool."""
    rows = jnp.arange(h // 2)[:, None]
    cols = jnp.arange(h)[None, :]
    return jnp.where(cols // 2 == rows, 0.5, 0.0).astype(dtype)


# -------------------------------- JAX wrapper --------------------------------


@functools.partial(jax.jit, static_argnames=("padding", "pool", "compute_dtype",
                                              "block_batch", "single_buffer_consts"))
def down_conv_block(x_nchw, params, padding=1, pool=True,
                    compute_dtype=jnp.float32, block_batch=None,
                    single_buffer_consts=True):
    """Forward pass of DownConvBlock. NCHW in / NCHW out (PyTorch convention).

    `compute_dtype=jnp.bfloat16` casts the MXU operands only (accumulation, bias
    add and ReLU stay f32) -- a matmul-throughput win on all TPU generations
    (the v5e MXU is bf16-native too); the f32 default matches reference numerics.
    """
    (cw1, cb1), (cw2, cb2), (cw3, cb3) = params
    n_batch, cin, h, w = x_nchw.shape
    cout = cw1.shape[-1]
    p = int(padding)

    # NCHW -> (N, H, W*Cin) lane-dense layout.
    # TODO(synk): fold the NCHW<->NHWC transposes into the band-packing index
    # bookkeeping so this compute-light block has no wrapper HBM transpose passes.
    x2d = jnp.transpose(x_nchw, (0, 2, 3, 1)).reshape(n_batch, h, w * cin)

    if pool:
        assert h % 2 == 0 and w % 2 == 0, "pooling path assumes even H, W"
        # TODO(synk): AvgPool2d ceil_mode partial windows (odd H/W) not handled.
        h0, w0 = h // 2, w // 2
    else:
        h0, w0 = h, w
    h1, w1 = h0 + 2 * p - 2, w0 + 2 * p - 2
    h2, w2 = h1 + 2 * p - 2, w1 + 2 * p - 2
    h3, w3 = h2 + 2 * p - 2, w2 + 2 * p - 2

    # One-time weight packing (banded: dx taps + W zero padding folded into K/N).
    # TODO(synk): bands are O(W^2*Cin*Cout); above W*C ~ a few K switch to per-dx
    # matmuls (K=C_in, pltpu.roll lane shifts) or an H/W-tiled grid with halo.
    if pool:
        band1 = _pack_band_pooled(cw1, w, p, compute_dtype)
        hpool = _pack_hpool(h, jnp.float32)        # pooling stays exact in f32
    else:
        band1 = _pack_band(cw1, w0, p, compute_dtype)
    band2 = _pack_band(cw2, w1, p, compute_dtype)
    band3 = _pack_band(cw3, w2, p, compute_dtype)
    brow1 = jnp.tile(cb1, w1)[None, :].astype(jnp.float32)
    brow2 = jnp.tile(cb2, w2)[None, :].astype(jnp.float32)
    brow3 = jnp.tile(cb3, w3)[None, :].astype(jnp.float32)

    k1 = w * cin
    k_max = max(k1, w1 * cout, w2 * cout)
    hp_max = max(h0, h1, h2) + 2 * p

    # ---- VMEM budget + batch-block size (fold batch into the MXU M dimension) --
    out_isz = jnp.dtype(x_nchw.dtype).itemsize
    cdt_isz = jnp.dtype(compute_dtype).itemsize
    const_bufs = 1 if single_buffer_consts else 2
    const_bytes = const_bufs * cdt_isz * (band1.size + band2.size + band3.size)
    const_bytes += 4 * (brow1.size + brow2.size + brow3.size)
    if pool:
        const_bytes += 4 * hpool.size
    per_img = (2 * h * w * cin * 4                      # double-buffered input block
               + 2 * h3 * w3 * cout * out_isz           # double-buffered output block
               + hp_max * k_max * 4                     # f32 padded activation scratch
               + hp_max * k_max * cdt_isz)              # casted matmul operand
    try:
        vmem_cap = int(pltpu.get_tpu_info().vmem_capacity_bytes)
    except Exception:
        vmem_cap = 64 * 1024 * 1024                     # v7x physical VMEM (smallest)
    budget = int(0.5 * vmem_cap) - const_bytes
    if block_batch is None:
        bt = 1
        for cand in range(1, min(n_batch, 64) + 1):     # largest divisor that fits
            if n_batch % cand == 0 and cand * per_img <= budget:
                bt = cand
    else:
        bt = int(block_batch)
        assert n_batch % bt == 0, "block_batch must divide batch"
    vmem_limit = const_bytes + bt * per_img + (8 << 20)  # + Mosaic-internal headroom
    vmem_limit = max(32 << 20, vmem_limit)
    vmem_limit = min(vmem_limit, min(100 << 20, int(0.9 * vmem_cap)))

    def const_spec(arr):
        zeros = (0,) * arr.ndim
        idx = lambda n, _z=zeros: _z                    # noqa: E731  resident block
        if single_buffer_consts:
            # Constant index map -> fetched once; single-buffer to free VMEM headroom.
            return pl.BlockSpec(arr.shape, idx, pipeline_mode=pl.Buffered(1))
        return pl.BlockSpec(arr.shape, idx)

    # NOTE: output lanes = w3*cout; below 128 lanes stores are masked (vst.msk) --
    # accepted here, the batch-into-rows fold is the bigger lever at these shapes.
    inputs = [x2d, band1, band2, band3, brow1, brow2, brow3]
    in_specs = [pl.BlockSpec((bt, h, w * cin), lambda n: (n, 0, 0))]
    in_specs += [const_spec(a) for a in (band1, band2, band3, brow1, brow2, brow3)]
    if pool:
        inputs = [hpool] + inputs
        in_specs = [const_spec(hpool)] + in_specs

    kernel = functools.partial(_down_block_kernel, pool=pool, pad=p)

    out2d = pl.pallas_call(
        kernel,
        out_shape=jax.ShapeDtypeStruct((n_batch, h3, w3 * cout), x_nchw.dtype),
        grid_spec=pltpu.PrefetchScalarGridSpec(
            num_scalar_prefetch=0,
            grid=(n_batch // bt,),                       # pipelined over batch blocks
            in_specs=in_specs,
            out_specs=pl.BlockSpec((bt, h3, w3 * cout), lambda n: (n, 0, 0)),
            scratch_shapes=[pltpu.VMEM((bt * hp_max, k_max), jnp.float32)],
        ),
        compiler_params=pltpu.CompilerParams(
            dimension_semantics=("parallel",),           # shard batch blocks over TCs
            vmem_limit_bytes=int(vmem_limit)),
    )(*inputs)

    out = out2d.reshape(n_batch, h3, w3, cout)
    return jnp.transpose(out, (0, 3, 1, 2))              # back to NCHW


# ------------------------------- params / ref --------------------------------


def init_down_conv_block_params(key, input_dim, output_dim):
    """Deterministic init mirroring init_weights (kaiming fan_in relu, trunc-normal bias)."""
    params = []
    cin = input_dim
    for _ in range(3):
        key, kw_, kb_ = jax.random.split(key, 3)
        fan_in = cin * 3 * 3
        std = (2.0 / fan_in) ** 0.5
        wgt = jax.random.normal(kw_, (3, 3, cin, output_dim), jnp.float32) * std
        bias = jax.random.truncated_normal(kb_, -2.0, 2.0, (output_dim,),
                                           jnp.float32) * 0.001
        params.append((wgt, bias))
        cin = output_dim
    return params


def _reference(x_nchw, params, padding=1, pool=True):
    x = jnp.transpose(x_nchw, (0, 2, 3, 1))
    if pool:
        n, h, w, c = x.shape
        x = x.reshape(n, h // 2, 2, w // 2, 2, c).mean(axis=(2, 4))
    for (wgt, bias) in params:
        x = jax.lax.conv_general_dilated(
            x, wgt, window_strides=(1, 1),
            padding=[(padding, padding), (padding, padding)],
            dimension_numbers=("NHWC", "HWIO", "NHWC"))
        x = jnp.maximum(x + bias, 0.0)
    return jnp.transpose(x, (0, 3, 1, 2))


# ----------------------------------- main ------------------------------------


if __name__ == "__main__":
    key = jax.random.PRNGKey(0)
    kx, kp = jax.random.split(key)

    batch, input_dim, output_dim, spatial = 2, 4, 8, 16
    padding, pool = 1, True

    x = jax.random.normal(kx, (batch, input_dim, spatial, spatial), jnp.float32)
    params = init_down_conv_block_params(kp, input_dim, output_dim)

    def run(**kw):
        try:
            return jax.block_until_ready(
                down_conv_block(x, params, padding=padding, pool=pool, **kw))
        except Exception:
            # pl.Buffered(1) single-buffering unsupported on this JAX/libtpu combo:
            # fall back to default double-buffered constant blocks.
            return jax.block_until_ready(
                down_conv_block(x, params, padding=padding, pool=pool,
                                single_buffer_consts=False, **kw))

    ref = _reference(x, params, padding=padding, pool=pool)

    out = run()                                           # f32 path (reference numerics)
    assert out.shape == (batch, output_dim, spatial // 2, spatial // 2), out.shape
    assert jnp.allclose(out, ref, atol=1e-4, rtol=1e-4), "f32 mismatch vs reference"

    out_bf16 = run(compute_dtype=jnp.bfloat16)            # bf16 MXU operands, f32 accum
    assert jnp.allclose(out_bf16, ref, atol=5e-2, rtol=5e-2), "bf16 mismatch vs reference"

    print("KERNEL_OK")
</pallas_src>

<mosaic_0001>
module attributes {stable_mosaic.version = 11 : i64} {
  func.func @_down_block_kernel(%arg0: i32, %arg1: memref<8x16xf32, #tpu.memory_space<vmem>>, %arg2: memref<2x16x64xf32, #tpu.memory_space<vmem>>, %arg3: memref<3x64x64xf32, #tpu.memory_space<vmem>>, %arg4: memref<3x64x64xf32, #tpu.memory_space<vmem>>, %arg5: memref<3x64x64xf32, #tpu.memory_space<vmem>>, %arg6: memref<1x64xf32, #tpu.memory_space<vmem>>, %arg7: memref<1x64xf32, #tpu.memory_space<vmem>>, %arg8: memref<1x64xf32, #tpu.memory_space<vmem>>, %arg9: memref<2x8x64xf32, #tpu.memory_space<vmem>>, %arg10: memref<20x64xf32, #tpu.memory_space<vmem>>) attributes {dimension_semantics = [#tpu.dimension_semantics<parallel>], iteration_bounds = array<i64: 1>, scalar_prefetch = 0 : i64, scratch_operands = 1 : i64, tpu.core_type = #tpu.core_type<tc>, window_params = [{pipeline_mode = #tpu.pipeline_mode<synchronous>, transform_indices = @transform_0, window_bounds = array<i64: 8, 16>}, {transform_indices = @transform_1, window_bounds = array<i64: 2, 16, 64>}, {pipeline_mode = #tpu.pipeline_mode<synchronous>, transform_indices = @transform_2, window_bounds = array<i64: 3, 64, 64>}, {pipeline_mode = #tpu.pipeline_mode<synchronous>, transform_indices = @transform_3, window_bounds = array<i64: 3, 64, 64>}, {pipeline_mode = #tpu.pipeline_mode<synchronous>, transform_indices = @transform_4, window_bounds = array<i64: 3, 64, 64>}, {pipeline_mode = #tpu.pipeline_mode<synchronous>, transform_indices = @transform_5, window_bounds = array<i64: 1, 64>}, {pipeline_mode = #tpu.pipeline_mode<synchronous>, transform_indices = @transform_6, window_bounds = array<i64: 1, 64>}, {pipeline_mode = #tpu.pipeline_mode<synchronous>, transform_indices = @transform_7, window_bounds = array<i64: 1, 64>}, {transform_indices = @transform_8, window_bounds = array<i64: 2, 8, 64>}]} {
    %c0 = arith.constant 0 : index
    %c0_0 = arith.constant 0 : index
    %0 = vector.load %arg1[%c0, %c0_0] : memref<8x16xf32, #tpu.memory_space<vmem>>, vector<8x16xf32>
    %c0_1 = arith.constant 0 : index
    %c0_2 = arith.constant 0 : index
    %c0_3 = arith.constant 0 : index
    %1 = vector.load %arg2[%c0_1, %c0_2, %c0_3] : memref<2x16x64xf32, #tpu.memory_space<vmem>>, vector<1x16x64xf32>
    %2 = vector.shape_cast %1 : vector<1x16x64xf32> to vector<16x64xf32>
    %cst = arith.constant dense<0.000000e+00> : vector<8x64xf32>
    %3 = tpu.matmul %0, %2, %cst {dimension_numbers = #tpu.dot_dimension_numbers<[1], [0], [0], [1], [0, 0, 1, 1], [], []>} : vector<8x16xf32>, vector<16x64xf32>, vector<8x64xf32> -> vector<8x64xf32>
    %cst_4 = arith.constant 0.000000e+00 : f32
    %4 = vector.broadcast %cst_4 : f32 to vector<1x64xf32>
    %c0_5 = arith.constant 0 : index
    %c0_6 = arith.constant 0 : index
    %5 = vector.load %arg10[%c0_5, %c0_6] : memref<20x64xf32, #tpu.memory_space<vmem>>, vector<1x64xf32>
    tpu.vector_store %arg10[%c0_5, %c0_6], %4 {strides = array<i32>} : memref<20x64xf32, #tpu.memory_space<vmem>>, vector<1x64xf32>,
    %c9 = arith.constant 9 : index
    %c0_7 = arith.constant 0 : index
    %6 = vector.load %arg10[%c9, %c0_7] : memref<20x64xf32, #tpu.memory_space<vmem>>, vector<1x64xf32>
    tpu.vector_store %arg10[%c9, %c0_7], %4 {strides = array<i32>} : memref<20x64xf32, #tpu.memory_space<vmem>>, vector<1x64xf32>,
    %c1 = arith.constant 1 : index
    %c0_8 = arith.constant 0 : index
    %7 = vector.load %arg10[%c1, %c0_8] : memref<20x64xf32, #tpu.memory_space<vmem>>, vector<8x64xf32>
    tpu.vector_store %arg10[%c1, %c0_8], %3 {strides = array<i32>} : memref<20x64xf32, #tpu.memory_space<vmem>>, vector<8x64xf32>,
    %c1_9 = arith.constant 1 : index
    %c0_10 = arith.constant 0 : index
    %c0_11 = arith.constant 0 : index
    %8 = vector.load %arg2[%c1_9, %c0_10, %c0_11] : memref<2x16x64xf32, #tpu.memory_space<vmem>>, vector<1x16x64xf32>
    %9 = vector.shape_cast %8 : vector<1x16x64xf32> to vector<16x64xf32>
    %cst_12 = arith.constant dense<0.000000e+00> : vector<8x64xf32>
    %10 = tpu.matmul %0, %9, %cst_12 {dimension_numbers = #tpu.dot_dimension_numbers<[1], [0], [0], [1], [0, 0, 1, 1], [], []>} : vector<8x16xf32>, vector<16x64xf32>, vector<8x64xf32> -> vector<8x64xf32>
    %cst_13 = arith.constant 0.000000e+00 : f32
    %11 = vector.broadcast %cst_13 : f32 to vector<1x64xf32>
    %c10 = arith.constant 10 : index
    %c0_14 = arith.constant 0 : index
    %12 = vector.load %arg10[%c10, %c0_14] : memref<20x64xf32, #tpu.memory_space<vmem>>, vector<1x64xf32>
    tpu.vector_store %arg10[%c10, %c0_14], %11 {strides = array<i32>} : memref<20x64xf32, #tpu.memory_space<vmem>>, vector<1x64xf32>,
    %c19 = arith.constant 19 : index
    %c0_15 = arith.constant 0 : index
    %13 = vector.load %arg10[%c19, %c0_15] : memref<20x64xf32, #tpu.memory_space<vmem>>, vector<1x64xf32>
    tpu.vector_store %arg10[%c19, %c0_15], %11 {strides = array<i32>} : memref<20x64xf32, #tpu.memory_space<vmem>>, vector<1x64xf32>,
    %c11 = arith.constant 11 : index
    %c0_16 = arith.constant 0 : index
    %14 = vector.load %arg10[%c11, %c0_16] : memref<20x64xf32, #tpu.memory_space<vmem>>, vector<8x64xf32>
    tpu.vector_store %arg10[%c11, %c0_16], %10 {strides = array<i32>} : memref<20x64xf32, #tpu.memory_space<vmem>>, vector<8x64xf32>,
    %c0_17 = arith.constant 0 : index
    %c0_18 = arith.constant 0 : index
    %15 = vector.load %arg10[%c0_17, %c0_18] : memref<20x64xf32, #tpu.memory_space<vmem>>, vector<20x64xf32>
    %c0_19 = arith.constant 0 : index
    %c0_20 = arith.constant 0 : index
    %16 = vector.load %arg6[%c0_19, %c0_20] : memref<1x64xf32, #tpu.memory_space<vmem>>, vector<1x64xf32>
    %17 = vector.shape_cast %16 : vector<1x64xf32> to vector<1x64xf32>
    %18 = vector.broadcast %17 : vector<1x64xf32> to vector<18x64xf32>
    %19 = vector.extract_strided_slice %15 {offsets = [0, 0], sizes = [18, 64], strides = [1, 1]} : vector<20x64xf32> to vector<18x64xf32>
    %c0_21 = arith.constant 0 : index
    %c0_22 = arith.constant 0 : index
    %c0_23 = arith.constant 0 : index
    %20 = vector.load %arg3[%c0_21, %c0_22, %c0_23] : memref<3x64x64xf32, #tpu.memory_space<vmem>>, vector<1x64x64xf32>
    %21 = vector.shape_cast %20 : vector<1x64x64xf32> to vector<64x64xf32>
    %cst_24 = arith.constant dense<0.000000e+00> : vector<18x64xf32>
    %22 = tpu.matmul %19, %21, %cst_24 {dimension_numbers = #tpu.dot_dimension_numbers<[1], [0], [0], [1], [0, 0, 1, 1], [], []>} : vector<18x64xf32>, vector<64x64xf32>, vector<18x64xf32> -> vector<18x64xf32>
    %23 = arith.addf %18, %22 : vector<18x64xf32>
    %24 = vector.extract_strided_slice %15 {offsets = [1, 0], sizes = [18, 64], strides = [1, 1]} : vector<20x64xf32> to vector<18x64xf32>
    %c1_25 = arith.constant 1 : index
    %c0_26 = arith.constant 0 : index
    %c0_27 = arith.constant 0 : index
    %25 = vector.load %arg3[%c1_25, %c0_26, %c0_27] : memref<3x64x64xf32, #tpu.memory_space<vmem>>, vector<1x64x64xf32>
    %26 = vector.shape_cast %25 : vector<1x64x64xf32> to vector<64x64xf32>
    %cst_28 = arith.constant dense<0.000000e+00> : vector<18x64xf32>
    %27 = tpu.matmul %24, %26, %cst_28 {dimension_numbers = #tpu.dot_dimension_numbers<[1], [0], [0], [1], [0, 0, 1, 1], [], []>} : vector<18x64xf32>, vector<64x64xf32>, vector<18x64xf32> -> vector<18x64xf32>
    %28 = arith.addf %23, %27 : vector<18x64xf32>
    %29 = vector.extract_strided_slice %15 {offsets = [2, 0], sizes = [18, 64], strides = [1, 1]} : vector<20x64xf32> to vector<18x64xf32>
    %c2 = arith.constant 2 : index
    %c0_29 = arith.constant 0 : index
    %c0_30 = arith.constant 0 : index
    %30 = vector.load %arg3[%c2, %c0_29, %c0_30] : memref<3x64x64xf32, #tpu.memory_space<vmem>>, vector<1x64x64xf32>
    %31 = vector.shape_cast %30 : vector<1x64x64xf32> to vector<64x64xf32>
    %cst_31 = arith.constant dense<0.000000e+00> : vector<18x64xf32>
    %32 = tpu.matmul %29, %31, %cst_31 {dimension_numbers = #tpu.dot_dimension_numbers<[1], [0], [0], [1], [0, 0, 1, 1], [], []>} : vector<18x64xf32>, vector<64x64xf32>, vector<18x64xf32> -> vector<18x64xf32>
    %33 = arith.addf %28, %32 : vector<18x64xf32>
    %cst_32 = arith.constant 0.000000e+00 : f32
    %34 = vector.broadcast %cst_32 : f32 to vector<18x64xf32>
    %35 = arith.maximumf %33, %34 : vector<18x64xf32>
    %36 = vector.extract_strided_slice %35 {offsets = [0, 0], sizes = [8, 64], strides = [1, 1]} : vector<18x64xf32> to vector<8x64xf32>
    %cst_33 = arith.constant 0.000000e+00 : f32
    %37 = vector.broadcast %cst_33 : f32 to vector<1x64xf32>
    %c0_34 = arith.constant 0 : index
    %c0_35 = arith.constant 0 : index
    %38 = vector.load %arg10[%c0_34, %c0_35] : memref<20x64xf32, #tpu.memory_space<vmem>>, vector<1x64xf32>
    tpu.vector_store %arg10[%c0_34, %c0_35], %37 {strides = array<i32>} : memref<20x64xf32, #tpu.memory_space<vmem>>, vector<1x64xf32>,
    %c9_36 = arith.constant 9 : index
    %c0_37 = arith.constant 0 : index
    %39 = vector.load %arg10[%c9_36, %c0_37] : memref<20x64xf32, #tpu.memory_space<vmem>>, vector<1x64xf32>
    tpu.vector_store %arg10[%c9_36, %c0_37], %37 {strides = array<i32>} : memref<20x64xf32, #tpu.memory_space<vmem>>, vector<1x64xf32>,
    %c1_38 = arith.constant 1 : index
    %c0_39 = arith.constant 0 : index
    %40 = vector.load %arg10[%c1_38, %c0_39] : memref<20x64xf32, #tpu.memory_space<vmem>>, vector<8x64xf32>
    tpu.vector_store %arg10[%c1_38, %c0_39], %36 {strides = array<i32>} : memref<20x64xf32, #tpu.memory_space<vmem>>, vector<8x64xf32>,
    %41 = vector.extract_strided_slice %35 {offsets = [10, 0], sizes = [8, 64], strides = [1, 1]} : vector<18x64xf32> to vector<8x64xf32>
    %cst_40 = arith.constant 0.000000e+00 : f32
    %42 = vector.broadcast %cst_40 : f32 to vector<1x64xf32>
    %c10_41 = arith.constant 10 : index
    %c0_42 = arith.constant 0 : index
    %43 = vector.load %arg10[%c10_41, %c0_42] : memref<20x64xf32, #tpu.memory_space<vmem>>, vector<1x64xf32>
    tpu.vector_store %arg10[%c10_41, %c0_42], %42 {strides = array<i32>} : memref<20x64xf32, #tpu.memory_space<vmem>>, vector<1x64xf32>,
    %c19_43 = arith.constant 19 : index
    %c0_44 = arith.constant 0 : index
    %44 = vector.load %arg10[%c19_43, %c0_44] : memref<20x64xf32, #tpu.memory_space<vmem>>, vector<1x64xf32>
    tpu.vector_store %arg10[%c19_43, %c0_44], %42 {strides = array<i32>} : memref<20x64xf32, #tpu.memory_space<vmem>>, vector<1x64xf32>,
    %c11_45 = arith.constant 11 : index
    %c0_46 = arith.constant 0 : index
    %45 = vector.load %arg10[%c11_45, %c0_46] : memref<20x64xf32, #tpu.memory_space<vmem>>, vector<8x64xf32>
    tpu.vector_store %arg10[%c11_45, %c0_46], %41 {strides = array<i32>} : memref<20x64xf32, #tpu.memory_space<vmem>>, vector<8x64xf32>,
    %c0_47 = arith.constant 0 : index
    %c0_48 = arith.constant 0 : index
    %46 = vector.load %arg10[%c0_47, %c0_48] : memref<20x64xf32, #tpu.memory_space<vmem>>, vector<20x64xf32>
    %c0_49 = arith.constant 0 : index
    %c0_50 = arith.constant 0 : index
    %47 = vector.load %arg7[%c0_49, %c0_50] : memref<1x64xf32, #tpu.memory_space<vmem>>, vector<1x64xf32>
    %48 = vector.shape_cast %47 : vector<1x64xf32> to vector<1x64xf32>
    %49 = vector.broadcast %48 : vector<1x64xf32> to vector<18x64xf32>
    %50 = vector.extract_strided_slice %46 {offsets = [0, 0], sizes = [18, 64], strides = [1, 1]} : vector<20x64xf32> to vector<18x64xf32>
    %c0_51 = arith.constant 0 : index
    %c0_52 = arith.constant 0 : index
    %c0_53 = arith.constant 0 : index
    %51 = vector.load %arg4[%c0_51, %c0_52, %c0_53] : memref<3x64x64xf32, #tpu.memory_space<vmem>>, vector<1x64x64xf32>
    %52 = vector.shape_cast %51 : vector<1x64x64xf32> to vector<64x64xf32>
    %cst_54 = arith.constant dense<0.000000e+00> : vector<18x64xf32>
    %53 = tpu.matmul %50, %52, %cst_54 {dimension_numbers = #tpu.dot_dimension_numbers<[1], [0], [0], [1], [0, 0, 1, 1], [], []>} : vector<18x64xf32>, vector<64x64xf32>, vector<18x64xf32> -> vector<18x64xf32>
    %54 = arith.addf %49, %53 : vector<18x64xf32>
    %55 = vector.extract_strided_slice %46 {offsets = [1, 0], sizes = [18, 64], strides = [1, 1]} : vector<20x64xf32> to vector<18x64xf32>
    %c1_55 = arith.constant 1 : index
    %c0_56 = arith.constant 0 : index
    %c0_57 = arith.constant 0 : index
    %56 = vector.load %arg4[%c1_55, %c0_56, %c0_57] : memref<3x64x64xf32, #tpu.memory_space<vmem>>, vector<1x64x64xf32>
    %57 = vector.shape_cast %56 : vector<1x64x64xf32> to vector<64x64xf32>
    %cst_58 = arith.constant dense<0.000000e+00> : vector<18x64xf32>
    %58 = tpu.matmul %55, %57, %cst_58 {dimension_numbers = #tpu.dot_dimension_numbers<[1], [0], [0], [1], [0, 0, 1, 1], [], []>} : vector<18x64xf32>, vector<64x64xf32>, vector<18x64xf32> -> vector<18x64xf32>
    %59 = arith.addf %54, %58 : vector<18x64xf32>
    %60 = vector.extract_strided_slice %46 {offsets = [2, 0], sizes = [18, 64], strides = [1, 1]} : vector<20x64xf32> to vector<18x64xf32>
    %c2_59 = arith.constant 2 : index
    %c0_60 = arith.constant 0 : index
    %c0_61 = arith.constant 0 : index
    %61 = vector.load %arg4[%c2_59, %c0_60, %c0_61] : memref<3x64x64xf32, #tpu.memory_space<vmem>>, vector<1x64x64xf32>
    %62 = vector.shape_cast %61 : vector<1x64x64xf32> to vector<64x64xf32>
    %cst_62 = arith.constant dense<0.000000e+00> : vector<18x64xf32>
    %63 = tpu.matmul %60, %62, %cst_62 {dimension_numbers = #tpu.dot_dimension_numbers<[1], [0], [0], [1], [0, 0, 1, 1], [], []>} : vector<18x64xf32>, vector<64x64xf32>, vector<18x64xf32> -> vector<18x64xf32>
    %64 = arith.addf %59, %63 : vector<18x64xf32>
    %cst_63 = arith.constant 0.000000e+00 : f32
    %65 = vector.broadcast %cst_63 : f32 to vector<18x64xf32>
    %66 = arith.maximumf %64, %65 : vector<18x64xf32>
    %67 = vector.extract_strided_slice %66 {offsets = [0, 0], sizes = [8, 64], strides = [1, 1]} : vector<18x64xf32> to vector<8x64xf32>
    %cst_64 = arith.constant 0.000000e+00 : f32
    %68 = vector.broadcast %cst_64 : f32 to vector<1x64xf32>
    %c0_65 = arith.constant 0 : index
    %c0_66 = arith.constant 0 : index
    %69 = vector.load %arg10[%c0_65, %c0_66] : memref<20x64xf32, #tpu.memory_space<vmem>>, vector<1x64xf32>
    tpu.vector_store %arg10[%c0_65, %c0_66], %68 {strides = array<i32>} : memref<20x64xf32, #tpu.memory_space<vmem>>, vector<1x64xf32>,
    %c9_67 = arith.constant 9 : index
    %c0_68 = arith.constant 0 : index
    %70 = vector.load %arg10[%c9_67, %c0_68] : memref<20x64xf32, #tpu.memory_space<vmem>>, vector<1x64xf32>
    tpu.vector_store %arg10[%c9_67, %c0_68], %68 {strides = array<i32>} : memref<20x64xf32, #tpu.memory_space<vmem>>, vector<1x64xf32>,
    %c1_69 = arith.constant 1 : index
    %c0_70 = arith.constant 0 : index
    %71 = vector.load %arg10[%c1_69, %c0_70] : memref<20x64xf32, #tpu.memory_space<vmem>>, vector<8x64xf32>
    tpu.vector_store %arg10[%c1_69, %c0_70], %67 {strides = array<i32>} : memref<20x64xf32, #tpu.memory_space<vmem>>, vector<8x64xf32>,
    %72 = vector.extract_strided_slice %66 {offsets = [10, 0], sizes = [8, 64], strides = [1, 1]} : vector<18x64xf32> to vector<8x64xf32>
    %cst_71 = arith.constant 0.000000e+00 : f32
    %73 = vector.broadcast %cst_71 : f32 to vector<1x64xf32>
    %c10_72 = arith.constant 10 : index
    %c0_73 = arith.constant 0 : index
    %74 = vector.load %arg10[%c10_72, %c0_73] : memref<20x64xf32, #tpu.memory_space<vmem>>, vector<1x64xf32>
    tpu.vector_store %arg10[%c10_72, %c0_73], %73 {strides = array<i32>} : memref<20x64xf32, #tpu.memory_space<vmem>>, vector<1x64xf32>,
    %c19_74 = arith.constant 19 : index
    %c0_75 = arith.constant 0 : index
    %75 = vector.load %arg10[%c19_74, %c0_75] : memref<20x64xf32, #tpu.memory_space<vmem>>, vector<1x64xf32>
    tpu.vector_store %arg10[%c19_74, %c0_75], %73 {strides = array<i32>} : memref<20x64xf32, #tpu.memory_space<vmem>>, vector<1x64xf32>,
    %c11_76 = arith.constant 11 : index
    %c0_77 = arith.constant 0 : index
    %76 = vector.load %arg10[%c11_76, %c0_77] : memref<20x64xf32, #tpu.memory_space<vmem>>, vector<8x64xf32>
    tpu.vector_store %arg10[%c11_76, %c0_77], %72 {strides = array<i32>} : memref<20x64xf32, #tpu.memory_space<vmem>>, vector<8x64xf32>,
    %c0_78 = arith.constant 0 : index
    %c0_79 = arith.constant 0 : index
    %77 = vector.load %arg10[%c0_78, %c0_79] : memref<20x64xf32, #tpu.memory_space<vmem>>, vector<20x64xf32>
    %c0_80 = arith.constant 0 : index
    %c0_81 = arith.constant 0 : index
    %78 = vector.load %arg8[%c0_80, %c0_81] : memref<1x64xf32, #tpu.memory_space<vmem>>, vector<1x64xf32>
    %79 = vector.shape_cast %78 : vector<1x64xf32> to vector<1x64xf32>
    %80 = vector.broadcast %79 : vector<1x64xf32> to vector<18x64xf32>
    %81 = vector.extract_strided_slice %77 {offsets = [0, 0], sizes = [18, 64], strides = [1, 1]} : vector<20x64xf32> to vector<18x64xf32>
    %c0_82 = arith.constant 0 : index
    %c0_83 = arith.constant 0 : index
    %c0_84 = arith.constant 0 : index
    %82 = vector.load %arg5[%c0_82, %c0_83, %c0_84] : memref<3x64x64xf32, #tpu.memory_space<vmem>>, vector<1x64x64xf32>
    %83 = vector.shape_cast %82 : vector<1x64x64xf32> to vector<64x64xf32>
    %cst_85 = arith.constant dense<0.000000e+00> : vector<18x64xf32>
    %84 = tpu.matmul %81, %83, %cst_85 {dimension_numbers = #tpu.dot_dimension_numbers<[1], [0], [0], [1], [0, 0, 1, 1], [], []>} : vector<18x64xf32>, vector<64x64xf32>, vector<18x64xf32> -> vector<18x64xf32>
    %85 = arith.addf %80, %84 : vector<18x64xf32>
    %86 = vector.extract_strided_slice %77 {offsets = [1, 0], sizes = [18, 64], strides = [1, 1]} : vector<20x64xf32> to vector<18x64xf32>
    %c1_86 = arith.constant 1 : index
    %c0_87 = arith.constant 0 : index
    %c0_88 = arith.constant 0 : index
    %87 = vector.load %arg5[%c1_86, %c0_87, %c0_88] : memref<3x64x64xf32, #tpu.memory_space<vmem>>, vector<1x64x64xf32>
    %88 = vector.shape_cast %87 : vector<1x64x64xf32> to vector<64x64xf32>
    %cst_89 = arith.constant dense<0.000000e+00> : vector<18x64xf32>
    %89 = tpu.matmul %86, %88, %cst_89 {dimension_numbers = #tpu.dot_dimension_numbers<[1], [0], [0], [1], [0, 0, 1, 1], [], []>} : vector<18x64xf32>, vector<64x64xf32>, vector<18x64xf32> -> vector<18x64xf32>
    %90 = arith.addf %85, %89 : vector<18x64xf32>
    %91 = vector.extract_strided_slice %77 {offsets = [2, 0], sizes = [18, 64], strides = [1, 1]} : vector<20x64xf32> to vector<18x64xf32>
    %c2_90 = arith.constant 2 : index
    %c0_91 = arith.constant 0 : index
    %c0_92 = arith.constant 0 : index
    %92 = vector.load %arg5[%c2_90, %c0_91, %c0_92] : memref<3x64x64xf32, #tpu.memory_space<vmem>>, vector<1x64x64xf32>
    %93 = vector.shape_cast %92 : vector<1x64x64xf32> to vector<64x64xf32>
    %cst_93 = arith.constant dense<0.000000e+00> : vector<18x64xf32>
    %94 = tpu.matmul %91, %93, %cst_93 {dimension_numbers = #tpu.dot_dimension_numbers<[1], [0], [0], [1], [0, 0, 1, 1], [], []>} : vector<18x64xf32>, vector<64x64xf32>, vector<18x64xf32> -> vector<18x64xf32>
    %95 = arith.addf %90, %94 : vector<18x64xf32>
    %cst_94 = arith.constant 0.000000e+00 : f32
    %96 = vector.broadcast %cst_94 : f32 to vector<18x64xf32>
    %97 = arith.maximumf %95, %96 : vector<18x64xf32>
    %98 = vector.extract_strided_slice %97 {offsets = [0, 0], sizes = [8, 64], strides = [1, 1]} : vector<18x64xf32> to vector<8x64xf32>
    %c0_95 = arith.constant 0 : index
    %c0_96 = arith.constant 0 : index
    %c0_97 = arith.constant 0 : index
    %99 = vector.load %arg9[%c0_95, %c0_96, %c0_97] : memref<2x8x64xf32, #tpu.memory_space<vmem>>, vector<1x8x64xf32>
    %100 = vector.shape_cast %99 : vector<1x8x64xf32> to vector<8x64xf32>
    %101 = vector.shape_cast %98 : vector<8x64xf32> to vector<1x8x64xf32>
    tpu.vector_store %arg9[%c0_95, %c0_96, %c0_97], %101 {strides = array<i32>} : memref<2x8x64xf32, #tpu.memory_space<vmem>>, vector<1x8x64xf32>,
    %102 = vector.extract_strided_slice %97 {offsets = [10, 0], sizes = [8, 64], strides = [1, 1]} : vector<18x64xf32> to vector<8x64xf32>
    %c1_98 = arith.constant 1 : index
    %c0_99 = arith.constant 0 : index
    %c0_100 = arith.constant 0 : index
    %103 = vector.load %arg9[%c1_98, %c0_99, %c0_100] : memref<2x8x64xf32, #tpu.memory_space<vmem>>, vector<1x8x64xf32>
    %104 = vector.shape_cast %103 : vector<1x8x64xf32> to vector<8x64xf32>
    %105 = vector.shape_cast %102 : vector<8x64xf32> to vector<1x8x64xf32>
    tpu.vector_store %arg9[%c1_98, %c0_99, %c0_100], %105 {strides = array<i32>} : memref<2x8x64xf32, #tpu.memory_space<vmem>>, vector<1x8x64xf32>,
    return
  }
  func.func @transform_0(%arg0: i32) -> (i32, i32) {
    %c0_i32 = arith.constant 0 : i32
    %c0_i32_0 = arith.constant 0 : i32
    %c0_i32_1 = arith.constant 0 : i32
    return %c0_i32, %c0_i32_0 : i32, i32
  }
  func.func @transform_1(%arg0: i32) -> (i32, i32, i32) {
    %c0_i32 = arith.constant 0 : i32
    %c0_i32_0 = arith.constant 0 : i32
    %c0_i32_1 = arith.constant 0 : i32
    return %arg0, %c0_i32, %c0_i32_0 : i32, i32, i32
  }
  func.func @transform_2(%arg0: i32) -> (i32, i32, i32) {
    %c0_i32 = arith.constant 0 : i32
    %c0_i32_0 = arith.constant 0 : i32
    %c0_i32_1 = arith.constant 0 : i32
    %c0_i32_2 = arith.constant 0 : i32
    return %c0_i32, %c0_i32_0, %c0_i32_1 : i32, i32, i32
  }
  func.func @transform_3(%arg0: i32) -> (i32, i32, i32) {
    %c0_i32 = arith.constant 0 : i32
    %c0_i32_0 = arith.constant 0 : i32
    %c0_i32_1 = arith.constant 0 : i32
    %c0_i32_2 = arith.constant 0 : i32
    return %c0_i32, %c0_i32_0, %c0_i32_1 : i32, i32, i32
  }
  func.func @transform_4(%arg0: i32) -> (i32, i32, i32) {
    %c0_i32 = arith.constant 0 : i32
    %c0_i32_0 = arith.constant 0 : i32
    %c0_i32_1 = arith.constant 0 : i32
    %c0_i32_2 = arith.constant 0 : i32
    return %c0_i32, %c0_i32_0, %c0_i32_1 : i32, i32, i32
  }
  func.func @transform_5(%arg0: i32) -> (i32, i32) {
    %c0_i32 = arith.constant 0 : i32
    %c0_i32_0 = arith.constant 0 : i32
    %c0_i32_1 = arith.constant 0 : i32
    return %c0_i32, %c0_i32_0 : i32, i32
  }
  func.func @transform_6(%arg0: i32) -> (i32, i32) {
    %c0_i32 = arith.constant 0 : i32
    %c0_i32_0 = arith.constant 0 : i32
    %c0_i32_1 = arith.constant 0 : i32
    return %c0_i32, %c0_i32_0 : i32, i32
  }
  func.func @transform_7(%arg0: i32) -> (i32, i32) {
    %c0_i32 = arith.constant 0 : i32
    %c0_i32_0 = arith.constant 0 : i32
    %c0_i32_1 = arith.constant 0 : i32
    return %c0_i32, %c0_i32_0 : i32, i32
  }
  func.func @transform_8(%arg0: i32) -> (i32, i32, i32) {
    %c0_i32 = arith.constant 0 : i32
    %c0_i32_0 = arith.constant 0 : i32
    %c0_i32_1 = arith.constant 0 : i32
    return %arg0, %c0_i32, %c0_i32_0 : i32, i32, i32
  }
}

module attributes {stable_mosaic.version = 11 : i64} {
  func.func @_down_block_kernel(%arg0: i32, %arg1: memref<8x16xf32, #tpu.memory_space<vmem>>, %arg2: memref<2x16x64xf32, #tpu.memory_space<vmem>>, %arg3: memref<3x64x64xf32, #tpu.memory_space<vmem>>, %arg4: memref<3x64x64xf32, #tpu.memory_space<vmem>>, %arg5: memref<3x64x64xf32, #tpu.memory_space<vmem>>, %arg6: memref<1x64xf32, #tpu.memory_space<vmem>>, %arg7: memref<1x64xf32, #tpu.memory_space<vmem>>, %arg8: memref<1x64xf32, #tpu.memory_space<vmem>>, %arg9: memref<2x8x64xf32, #tpu.memory_space<vmem>>, %arg10: memref<20x64xf32, #tpu.memory_space<vmem>>) attributes {dimension_semantics = [#tpu.dimension_semantics<parallel>], iteration_bounds = array<i64: 1>, scalar_prefetch = 0 : i64, scratch_operands = 1 : i64, tpu.core_type = #tpu.core_type<tc>, window_params = [{pipeline_mode = #tpu.pipeline_mode<synchronous>, transform_indices = @transform_0, window_bounds = array<i64: 8, 16>}, {transform_indices = @transform_1, window_bounds = array<i64: 2, 16, 64>}, {pipeline_mode = #tpu.pipeline_mode<synchronous>, transform_indices = @transform_2, window_bounds = array<i64: 3, 64, 64>}, {pipeline_mode = #tpu.pipeline_mode<synchronous>, transform_indices = @transform_3, window_bounds = array<i64: 3, 64, 64>}, {pipeline_mode = #tpu.pipeline_mode<synchronous>, transform_indices = @transform_4, window_bounds = array<i64: 3, 64, 64>}, {pipeline_mode = #tpu.pipeline_mode<synchronous>, transform_indices = @transform_5, window_bounds = array<i64: 1, 64>}, {pipeline_mode = #tpu.pipeline_mode<synchronous>, transform_indices = @transform_6, window_bounds = array<i64: 1, 64>}, {pipeline_mode = #tpu.pipeline_mode<synchronous>, transform_indices = @transform_7, window_bounds = array<i64: 1, 64>}, {transform_indices = @transform_8, window_bounds = array<i64: 2, 8, 64>}]} {
    %c0 = arith.constant 0 : index
    %c0_0 = arith.constant 0 : index
    %0 = vector.load %arg1[%c0, %c0_0] : memref<8x16xf32, #tpu.memory_space<vmem>>, vector<8x16xf32>
    %c0_1 = arith.constant 0 : index
    %c0_2 = arith.constant 0 : index
    %c0_3 = arith.constant 0 : index
    %1 = vector.load %arg2[%c0_1, %c0_2, %c0_3] : memref<2x16x64xf32, #tpu.memory_space<vmem>>, vector<1x16x64xf32>
    %2 = vector.shape_cast %1 : vector<1x16x64xf32> to vector<16x64xf32>
    %cst = arith.constant dense<0.000000e+00> : vector<8x64xf32>
    %3 = tpu.matmul %0, %2, %cst {dimension_numbers = #tpu.dot_dimension_numbers<[1], [0], [0], [1], [0, 0, 1, 1], [], []>} : vector<8x16xf32>, vector<16x64xf32>, vector<8x64xf32> -> vector<8x64xf32>
    %cst_4 = arith.constant 0.000000e+00 : f32
    %4 = vector.broadcast %cst_4 : f32 to vector<1x64xf32>
    %c0_5 = arith.constant 0 : index
    %c0_6 = arith.constant 0 : index
    %5 = vector.load %arg10[%c0_5, %c0_6] : memref<20x64xf32, #tpu.memory_space<vmem>>, vector<1x64xf32>
    tpu.vector_store %arg10[%c0_5, %c0_6], %4 {strides = array<i32>} : memref<20x64xf32, #tpu.memory_space<vmem>>, vector<1x64xf32>,
    %c9 = arith.constant 9 : index
    %c0_7 = arith.constant 0 : index
    %6 = vector.load %arg10[%c9, %c0_7] : memref<20x64xf32, #tpu.memory_space<vmem>>, vector<1x64xf32>
    tpu.vector_store %arg10[%c9, %c0_7], %4 {strides = array<i32>} : memref<20x64xf32, #tpu.memory_space<vmem>>, vector<1x64xf32>,
    %c1 = arith.constant 1 : index
    %c0_8 = arith.constant 0 : index
    %7 = vector.load %arg10[%c1, %c0_8] : memref<20x64xf32, #tpu.memory_space<vmem>>, vector<8x64xf32>
    tpu.vector_store %arg10[%c1, %c0_8], %3 {strides = array<i32>} : memref<20x64xf32, #tpu.memory_space<vmem>>, vector<8x64xf32>,
    %c1_9 = arith.constant 1 : index
    %c0_10 = arith.constant 0 : index
    %c0_11 = arith.constant 0 : index
    %8 = vector.load %arg2[%c1_9, %c0_10, %c0_11] : memref<2x16x64xf32, #tpu.memory_space<vmem>>, vector<1x16x64xf32>
    %9 = vector.shape_cast %8 : vector<1x16x64xf32> to vector<16x64xf32>
    %cst_12 = arith.constant dense<0.000000e+00> : vector<8x64xf32>
    %10 = tpu.matmul %0, %9, %cst_12 {dimension_numbers = #tpu.dot_dimension_numbers<[1], [0], [0], [1], [0, 0, 1, 1], [], []>} : vector<8x16xf32>, vector<16x64xf32>, vector<8x64xf32> -> vector<8x64xf32>
    %cst_13 = arith.constant 0.000000e+00 : f32
    %11 = vector.broadcast %cst_13 : f32 to vector<1x64xf32>
    %c10 = arith.constant 10 : index
    %c0_14 = arith.constant 0 : index
    %12 = vector.load %arg10[%c10, %c0_14] : memref<20x64xf32, #tpu.memory_space<vmem>>, vector<1x64xf32>
    tpu.vector_store %arg10[%c10, %c0_14], %11 {strides = array<i32>} : memref<20x64xf32, #tpu.memory_space<vmem>>, vector<1x64xf32>,
    %c19 = arith.constant 19 : index
    %c0_15 = arith.constant 0 : index
    %13 = vector.load %arg10[%c19, %c0_15] : memref<20x64xf32, #tpu.memory_space<vmem>>, vector<1x64xf32>
    tpu.vector_store %arg10[%c19, %c0_15], %11 {strides = array<i32>} : memref<20x64xf32, #tpu.memory_space<vmem>>, vector<1x64xf32>,
    %c11 = arith.constant 11 : index
    %c0_16 = arith.constant 0 : index
    %14 = vector.load %arg10[%c11, %c0_16] : memref<20x64xf32, #tpu.memory_space<vmem>>, vector<8x64xf32>
    tpu.vector_store %arg10[%c11, %c0_16], %10 {strides = array<i32>} : memref<20x64xf32, #tpu.memory_space<vmem>>, vector<8x64xf32>,
    %c0_17 = arith.constant 0 : index
    %c0_18 = arith.constant 0 : index
    %15 = vector.load %arg10[%c0_17, %c0_18] : memref<20x64xf32, #tpu.memory_space<vmem>>, vector<20x64xf32>
    %c0_19 = arith.constant 0 : index
    %c0_20 = arith.constant 0 : index
    %16 = vector.load %arg6[%c0_19, %c0_20] : memref<1x64xf32, #tpu.memory_space<vmem>>, vector<1x64xf32>
    %17 = vector.shape_cast %16 : vector<1x64xf32> to vector<1x64xf32>
    %18 = vector.broadcast %17 : vector<1x64xf32> to vector<18x64xf32>
    %19 = vector.extract_strided_slice %15 {offsets = [0, 0], sizes = [18, 64], strides = [1, 1]} : vector<20x64xf32> to vector<18x64xf32>
    %c0_21 = arith.constant 0 : index
    %c0_22 = arith.constant 0 : index
    %c0_23 = arith.constant 0 : index
    %20 = vector.load %arg3[%c0_21, %c0_22, %c0_23] : memref<3x64x64xf32, #tpu.memory_space<vmem>>, vector<1x64x64xf32>
    %21 = vector.shape_cast %20 : vector<1x64x64xf32> to vector<64x64xf32>
    %cst_24 = arith.constant dense<0.000000e+00> : vector<18x64xf32>
    %22 = tpu.matmul %19, %21, %cst_24 {dimension_numbers = #tpu.dot_dimension_numbers<[1], [0], [0], [1], [0, 0, 1, 1], [], []>} : vector<18x64xf32>, vector<64x64xf32>, vector<18x64xf32> -> vector<18x64xf32>
    %23 = arith.addf %18, %22 : vector<18x64xf32>
    %24 = vector.extract_strided_slice %15 {offsets = [1, 0], sizes = [18, 64], strides = [1, 1]} : vector<20x64xf32> to vector<18x64xf32>
    %c1_25 = arith.constant 1 : index
    %c0_26 = arith.constant 0 : index
    %c0_27 = arith.constant 0 : index
    %25 = vector.load %arg3[%c1_25, %c0_26, %c0_27] : memref<3x64x64xf32, #tpu.memory_space<vmem>>, vector<1x64x64xf32>
    %26 = vector.shape_cast %25 : vector<1x64x64xf32> to vector<64x64xf32>
    %cst_28 = arith.constant dense<0.000000e+00> : vector<18x64xf32>
    %27 = tpu.matmul %24, %26, %cst_28 {dimension_numbers = #tpu.dot_dimension_numbers<[1], [0], [0], [1], [0, 0, 1, 1], [], []>} : vector<18x64xf32>, vector<64x64xf32>, vector<18x64xf32> -> vector<18x64xf32>
    %28 = arith.addf %23, %27 : vector<18x64xf32>
    %29 = vector.extract_strided_slice %15 {offsets = [2, 0], sizes = [18, 64], strides = [1, 1]} : vector<20x64xf32> to vector<18x64xf32>
    %c2 = arith.constant 2 : index
    %c0_29 = arith.constant 0 : index
    %c0_30 = arith.constant 0 : index
    %30 = vector.load %arg3[%c2, %c0_29, %c0_30] : memref<3x64x64xf32, #tpu.memory_space<vmem>>, vector<1x64x64xf32>
    %31 = vector.shape_cast %30 : vector<1x64x64xf32> to vector<64x64xf32>
    %cst_31 = arith.constant dense<0.000000e+00> : vector<18x64xf32>
    %32 = tpu.matmul %29, %31, %cst_31 {dimension_numbers = #tpu.dot_dimension_numbers<[1], [0], [0], [1], [0, 0, 1, 1], [], []>} : vector<18x64xf32>, vector<64x64xf32>, vector<18x64xf32> -> vector<18x64xf32>
    %33 = arith.addf %28, %32 : vector<18x64xf32>
    %cst_32 = arith.constant 0.000000e+00 : f32
    %34 = vector.broadcast %cst_32 : f32 to vector<18x64xf32>
    %35 = arith.maximumf %33, %34 : vector<18x64xf32>
    %36 = vector.extract_strided_slice %35 {offsets = [0, 0], sizes = [8, 64], strides = [1, 1]} : vector<18x64xf32> to vector<8x64xf32>
    %cst_33 = arith.constant 0.000000e+00 : f32
    %37 = vector.broadcast %cst_33 : f32 to vector<1x64xf32>
    %c0_34 = arith.constant 0 : index
    %c0_35 = arith.constant 0 : index
    %38 = vector.load %arg10[%c0_34, %c0_35] : memref<20x64xf32, #tpu.memory_space<vmem>>, vector<1x64xf32>
    tpu.vector_store %arg10[%c0_34, %c0_35], %37 {strides = array<i32>} : memref<20x64xf32, #tpu.memory_space<vmem>>, vector<1x64xf32>,
    %c9_36 = arith.constant 9 : index
    %c0_37 = arith.constant 0 : index
    %39 = vector.load %arg10[%c9_36, %c0_37] : memref<20x64xf32, #tpu.memory_space<vmem>>, vector<1x64xf32>
    tpu.vector_store %arg10[%c9_36, %c0_37], %37 {strides = array<i32>} : memref<20x64xf32, #tpu.memory_space<vmem>>, vector<1x64xf32>,
    %c1_38 = arith.constant 1 : index
    %c0_39 = arith.constant 0 : index
    %40 = vector.load %arg10[%c1_38, %c0_39] : memref<20x64xf32, #tpu.memory_space<vmem>>, vector<8x64xf32>
    tpu.vector_store %arg10[%c1_38, %c0_39], %36 {strides = array<i32>} : memref<20x64xf32, #tpu.memory_space<vmem>>, vector<8x64xf32>,
    %41 = vector.extract_strided_slice %35 {offsets = [10, 0], sizes = [8, 64], strides = [1, 1]} : vector<18x64xf32> to vector<8x64xf32>
    %cst_40 = arith.constant 0.000000e+00 : f32
    %42 = vector.broadcast %cst_40 : f32 to vector<1x64xf32>
    %c10_41 = arith.constant 10 : index
    %c0_42 = arith.constant 0 : index
    %43 = vector.load %arg10[%c10_41, %c0_42] : memref<20x64xf32, #tpu.memory_space<vmem>>, vector<1x64xf32>
    tpu.vector_store %arg10[%c10_41, %c0_42], %42 {strides = array<i32>} : memref<20x64xf32, #tpu.memory_space<vmem>>, vector<1x64xf32>,
    %c19_43 = arith.constant 19 : index
    %c0_44 = arith.constant 0 : index
    %44 = vector.load %arg10[%c19_43, %c0_44] : memref<20x64xf32, #tpu.memory_space<vmem>>, vector<1x64xf32>
    tpu.vector_store %arg10[%c19_43, %c0_44], %42 {strides = array<i32>} : memref<20x64xf32, #tpu.memory_space<vmem>>, vector<1x64xf32>,
    %c11_45 = arith.constant 11 : index
    %c0_46 = arith.constant 0 : index
    %45 = vector.load %arg10[%c11_45, %c0_46] : memref<20x64xf32, #tpu.memory_space<vmem>>, vector<8x64xf32>
    tpu.vector_store %arg10[%c11_45, %c0_46], %41 {strides = array<i32>} : memref<20x64xf32, #tpu.memory_space<vmem>>, vector<8x64xf32>,
    %c0_47 = arith.constant 0 : index
    %c0_48 = arith.constant 0 : index
    %46 = vector.load %arg10[%c0_47, %c0_48] : memref<20x64xf32, #tpu.memory_space<vmem>>, vector<20x64xf32>
    %c0_49 = arith.constant 0 : index
    %c0_50 = arith.constant 0 : index
    %47 = vector.load %arg7[%c0_49, %c0_50] : memref<1x64xf32, #tpu.memory_space<vmem>>, vector<1x64xf32>
    %48 = vector.shape_cast %47 : vector<1x64xf32> to vector<1x64xf32>
    %49 = vector.broadcast %48 : vector<1x64xf32> to vector<18x64xf32>
    %50 = vector.extract_strided_slice %46 {offsets = [0, 0], sizes = [18, 64], strides = [1, 1]} : vector<20x64xf32> to vector<18x64xf32>
    %c0_51 = arith.constant 0 : index
    %c0_52 = arith.constant 0 : index
    %c0_53 = arith.constant 0 : index
    %51 = vector.load %arg4[%c0_51, %c0_52, %c0_53] : memref<3x64x64xf32, #tpu.memory_space<vmem>>, vector<1x64x64xf32>
    %52 = vector.shape_cast %51 : vector<1x64x64xf32> to vector<64x64xf32>
    %cst_54 = arith.constant dense<0.000000e+00> : vector<18x64xf32>
    %53 = tpu.matmul %50, %52, %cst_54 {dimension_numbers = #tpu.dot_dimension_numbers<[1], [0], [0], [1], [0, 0, 1, 1], [], []>} : vector<18x64xf32>, vector<64x64xf32>, vector<18x64xf32> -> vector<18x64xf32>
    %54 = arith.addf %49, %53 : vector<18x64xf32>
    %55 = vector.extract_strided_slice %46 {offsets = [1, 0], sizes = [18, 64], strides = [1, 1]} : vector<20x64xf32> to vector<18x64xf32>
    %c1_55 = arith.constant 1 : index
    %c0_56 = arith.constant 0 : index
    %c0_57 = arith.constant 0 : index
    %56 = vector.load %arg4[%c1_55, %c0_56, %c0_57] : memref<3x64x64xf32, #tpu.memory_space<vmem>>, vector<1x64x64xf32>
    %57 = vector.shape_cast %56 : vector<1x64x64xf32> to vector<64x64xf32>
    %cst_58 = arith.constant dense<0.000000e+00> : vector<18x64xf32>
    %58 = tpu.matmul %55, %57, %cst_58 {dimension_numbers = #tpu.dot_dimension_numbers<[1], [0], [0], [1], [0, 0, 1, 1], [], []>} : vector<18x64xf32>, vector<64x64xf32>, vector<18x64xf32> -> vector<18x64xf32>
    %59 = arith.addf %54, %58 : vector<18x64xf32>
    %60 = vector.extract_strided_slice %46 {offsets = [2, 0], sizes = [18, 64], strides = [1, 1]} : vector<20x64xf32> to vector<18x64xf32>
    %c2_59 = arith.constant 2 : index
    %c0_60 = arith.constant 0 : index
    %c0_61 = arith.constant 0 : index
    %61 = vector.load %arg4[%c2_59, %c0_60, %c0_61] : memref<3x64x64xf32, #tpu.memory_space<vmem>>, vector<1x64x64xf32>
    %62 = vector.shape_cast %61 : vector<1x64x64xf32> to vector<64x64xf32>
    %cst_62 = arith.constant dense<0.000000e+00> : vector<18x64xf32>
    %63 = tpu.matmul %60, %62, %cst_62 {dimension_numbers = #tpu.dot_dimension_numbers<[1], [0], [0], [1], [0, 0, 1, 1], [], []>} : vector<18x64xf32>, vector<64x64xf32>, vector<18x64xf32> -> vector<18x64xf32>
    %64 = arith.addf %59, %63 : vector<18x64xf32>
    %cst_63 = arith.constant 0.000000e+00 : f32
    %65 = vector.broadcast %cst_63 : f32 to vector<18x64xf32>
    %66 = arith.maximumf %64, %65 : vector<18x64xf32>
    %67 = vector.extract_strided_slice %66 {offsets = [0, 0], sizes = [8, 64], strides = [1, 1]} : vector<18x64xf32> to vector<8x64xf32>
    %cst_64 = arith.constant 0.000000e+00 : f32
    %68 = vector.broadcast %cst_64 : f32 to vector<1x64xf32>
    %c0_65 = arith.constant 0 : index
    %c0_66 = arith.constant 0 : index
    %69 = vector.load %arg10[%c0_65, %c0_66] : memref<20x64xf32, #tpu.memory_space<vmem>>, vector<1x64xf32>
    tpu.vector_store %arg10[%c0_65, %c0_66], %68 {strides = array<i32>} : memref<20x64xf32, #tpu.memory_space<vmem>>, vector<1x64xf32>,
    %c9_67 = arith.constant 9 : index
    %c0_68 = arith.constant 0 : index
    %70 = vector.load %arg10[%c9_67, %c0_68] : memref<20x64xf32, #tpu.memory_space<vmem>>, vector<1x64xf32>
    tpu.vector_store %arg10[%c9_67, %c0_68], %68 {strides = array<i32>} : memref<20x64xf32, #tpu.memory_space<vmem>>, vector<1x64xf32>,
    %c1_69 = arith.constant 1 : index
    %c0_70 = arith.constant 0 : index
    %71 = vector.load %arg10[%c1_69, %c0_70] : memref<20x64xf32, #tpu.memory_space<vmem>>, vector<8x64xf32>
    tpu.vector_store %arg10[%c1_69, %c0_70], %67 {strides = array<i32>} : memref<20x64xf32, #tpu.memory_space<vmem>>, vector<8x64xf32>,
    %72 = vector.extract_strided_slice %66 {offsets = [10, 0], sizes = [8, 64], strides = [1, 1]} : vector<18x64xf32> to vector<8x64xf32>
    %cst_71 = arith.constant 0.000000e+00 : f32
    %73 = vector.broadcast %cst_71 : f32 to vector<1x64xf32>
    %c10_72 = arith.constant 10 : index
    %c0_73 = arith.constant 0 : index
    %74 = vector.load %arg10[%c10_72, %c0_73] : memref<20x64xf32, #tpu.memory_space<vmem>>, vector<1x64xf32>
    tpu.vector_store %arg10[%c10_72, %c0_73], %73 {strides = array<i32>} : memref<20x64xf32, #tpu.memory_space<vmem>>, vector<1x64xf32>,
    %c19_74 = arith.constant 19 : index
    %c0_75 = arith.constant 0 : index
    %75 = vector.load %arg10[%c19_74, %c0_75] : memref<20x64xf32, #tpu.memory_space<vmem>>, vector<1x64xf32>
    tpu.vector_store %arg10[%c19_74, %c0_75], %73 {strides = array<i32>} : memref<20x64xf32, #tpu.memory_space<vmem>>, vector<1x64xf32>,
    %c11_76 = arith.constant 11 : index
    %c0_77 = arith.constant 0 : index
    %76 = vector.load %arg10[%c11_76, %c0_77] : memref<20x64xf32, #tpu.memory_space<vmem>>, vector<8x64xf32>
    tpu.vector_store %arg10[%c11_76, %c0_77], %72 {strides = array<i32>} : memref<20x64xf32, #tpu.memory_space<vmem>>, vector<8x64xf32>,
    %c0_78 = arith.constant 0 : index
    %c0_79 = arith.constant 0 : index
    %77 = vector.load %arg10[%c0_78, %c0_79] : memref<20x64xf32, #tpu.memory_space<vmem>>, vector<20x64xf32>
    %c0_80 = arith.constant 0 : index
    %c0_81 = arith.constant 0 : index
    %78 = vector.load %arg8[%c0_80, %c0_81] : memref<1x64xf32, #tpu.memory_space<vmem>>, vector<1x64xf32>
    %79 = vector.shape_cast %78 : vector<1x64xf32> to vector<1x64xf32>
    %80 = vector.broadcast %79 : vector<1x64xf32> to vector<18x64xf32>
    %81 = vector.extract_strided_slice %77 {offsets = [0, 0], sizes = [18, 64], strides = [1, 1]} : vector<20x64xf32> to vector<18x64xf32>
    %c0_82 = arith.constant 0 : index
    %c0_83 = arith.constant 0 : index
    %c0_84 = arith.constant 0 : index
    %82 = vector.load %arg5[%c0_82, %c0_83, %c0_84] : memref<3x64x64xf32, #tpu.memory_space<vmem>>, vector<1x64x64xf32>
    %83 = vector.shape_cast %82 : vector<1x64x64xf32> to vector<64x64xf32>
    %cst_85 = arith.constant dense<0.000000e+00> : vector<18x64xf32>
    %84 = tpu.matmul %81, %83, %cst_85 {dimension_numbers = #tpu.dot_dimension_numbers<[1], [0], [0], [1], [0, 0, 1, 1], [], []>} : vector<18x64xf32>, vector<64x64xf32>, vector<18x64xf32> -> vector<18x64xf32>
    %85 = arith.addf %80, %84 : vector<18x64xf32>
    %86 = vector.extract_strided_slice %77 {offsets = [1, 0], sizes = [18, 64], strides = [1, 1]} : vector<20x64xf32> to vector<18x64xf32>
    %c1_86 = arith.constant 1 : index
    %c0_87 = arith.constant 0 : index
    %c0_88 = arith.constant 0 : index
    %87 = vector.load %arg5[%c1_86, %c0_87, %c0_88] : memref<3x64x64xf32, #tpu.memory_space<vmem>>, vector<1x64x64xf32>
    %88 = vector.shape_cast %87 : vector<1x64x64xf32> to vector<64x64xf32>
    %cst_89 = arith.constant dense<0.000000e+00> : vector<18x64xf32>
    %89 = tpu.matmul %86, %88, %cst_89 {dimension_numbers = #tpu.dot_dimension_numbers<[1], [0], [0], [1], [0, 0, 1, 1], [], []>} : vector<18x64xf32>, vector<64x64xf32>, vector<18x64xf32> -> vector<18x64xf32>
    %90 = arith.addf %85, %89 : vector<18x64xf32>
    %91 = vector.extract_strided_slice %77 {offsets = [2, 0], sizes = [18, 64], strides = [1, 1]} : vector<20x64xf32> to vector<18x64xf32>
    %c2_90 = arith.constant 2 : index
    %c0_91 = arith.constant 0 : index
    %c0_92 = arith.constant 0 : index
    %92 = vector.load %arg5[%c2_90, %c0_91, %c0_92] : memref<3x64x64xf32, #tpu.memory_space<vmem>>, vector<1x64x64xf32>
    %93 = vector.shape_cast %92 : vector<1x64x64xf32> to vector<64x64xf32>
    %cst_93 = arith.constant dense<0.000000e+00> : vector<18x64xf32>
    %94 = tpu.matmul %91, %93, %cst_93 {dimension_numbers = #tpu.dot_dimension_numbers<[1], [0], [0], [1], [0, 0, 1, 1], [], []>} : vector<18x64xf32>, vector<64x64xf32>, vector<18x64xf32> -> vector<18x64xf32>
    %95 = arith.addf %90, %94 : vector<18x64xf32>
    %cst_94 = arith.constant 0.000000e+00 : f32
    %96 = vector.broadcast %cst_94 : f32 to vector<18x64xf32>
    %97 = arith.maximumf %95, %96 : vector<18x64xf32>
    %98 = vector.extract_strided_slice %97 {offsets = [0, 0], sizes = [8, 64], strides = [1, 1]} : vector<18x64xf32> to vector<8x64xf32>
    %c0_95 = arith.constant 0 : index
    %c0_96 = arith.constant 0 : index
    %c0_97 = arith.constant 0 : index
    %99 = vector.load %arg9[%c0_95, %c0_96, %c0_97] : memref<2x8x64xf32, #tpu.memory_space<vmem>>, vector<1x8x64xf32>
    %100 = vector.shape_cast %99 : vector<1x8x64xf32> to vector<8x64xf32>
    %101 = vector.shape_cast %98 : vector<8x64xf32> to vector<1x8x64xf32>
    tpu.vector_store %arg9[%c0_95, %c0_96, %c0_97], %101 {strides = array<i32>} : memref<2x8x64xf32, #tpu.memory_space<vmem>>, vector<1x8x64xf32>,
    %102 = vector.extract_strided_slice %97 {offsets = [10, 0], sizes = [8, 64], strides = [1, 1]} : vector<18x64xf32> to vector<8x64xf32>
    %c1_98 = arith.constant 1 : index
    %c0_99 = arith.constant 0 : index
    %c0_100 = arith.constant 0 : index
    %103 = vector.load %arg9[%c1_98, %c0_99, %c0_100] : memref<2x8x64xf32, #tpu.memory_space<vmem>>, vector<1x8x64xf32>
    %104 = vector.shape_cast %103 : vector<1x8x64xf32> to vector<8x64xf32>
    %105 = vector.shape_cast %102 : vector<8x64xf32> to vector<1x8x64xf32>
    tpu.vector_store %arg9[%c1_98, %c0_99, %c0_100], %105 {strides = array<i32>} : memref<2x8x64xf32, #tpu.memory_space<vmem>>, vector<1x8x64xf32>,
    return
  }
  func.func @transform_0(%arg0: i32) -> (i32, i32) {
    %c0_i32 = arith.constant 0 : i32
    %c0_i32_0 = arith.constant 0 : i32
    %c0_i32_1 = arith.constant 0 : i32
    return %c0_i32, %c0_i32_0 : i32, i32
  }
  func.func @transform_1(%arg0: i32) -> (i32, i32, i32) {
    %c0_i32 = arith.constant 0 : i32
    %c0_i32_0 = arith.constant 0 : i32
    %c0_i32_1 = arith.constant 0 : i32
    return %arg0, %c0_i32, %c0_i32_0 : i32, i32, i32
  }
  func.func @transform_2(%arg0: i32) -> (i32, i32, i32) {
    %c0_i32 = arith.constant 0 : i32
    %c0_i32_0 = arith.constant 0 : i32
    %c0_i32_1 = arith.constant 0 : i32
    %c0_i32_2 = arith.constant 0 : i32
    return %c0_i32, %c0_i32_0, %c0_i32_1 : i32, i32, i32
  }
  func.func @transform_3(%arg0: i32) -> (i32, i32, i32) {
    %c0_i32 = arith.constant 0 : i32
    %c0_i32_0 = arith.constant 0 : i32
    %c0_i32_1 = arith.constant 0 : i32
    %c0_i32_2 = arith.constant 0 : i32
    return %c0_i32, %c0_i32_0, %c0_i32_1 : i32, i32, i32
  }
  func.func @transform_4(%arg0: i32) -> (i32, i32, i32) {
    %c0_i32 = arith.constant 0 : i32
    %c0_i32_0 = arith.constant 0 : i32
    %c0_i32_1 = arith.constant 0 : i32
    %c0_i32_2 = arith.constant 0 : i32
    return %c0_i32, %c0_i32_0, %c0_i32_1 : i32, i32, i32
  }
  func.func @transform_5(%arg0: i32) -> (i32, i32) {
    %c0_i32 = arith.constant 0 : i32
    %c0_i32_0 = arith.constant 0 : i32
    %c0_i32_1 = arith.constant 0 : i32
    return %c0_i32, %c0_i32_0 : i32, i32
  }
  func.func @transform_6(%arg0: i32) -> (i32, i32) {
    %c0_i32 = arith.constant 0 : i32
    %c0_i32_0 = arith.constant 0 : i32
    %c0_i32_1 = arith.constant 0 : i32
    return %c0_i32, %c0_i32_0 : i32, i32
  }
  func.func @transform_7(%arg0: i32) -> (i32, i32) {
    %c0_i32 = arith.constant 0 : i32
    %c0_i32_0 = arith.constant 0 : i32
    %c0_i32_1 = arith.constant 0 : i32
    return %c0_i32, %c0_i32_0 : i32, i32
  }
  func.func @transform_8(%arg0: i32) -> (i32, i32, i32) {
    %c0_i32 = arith.constant 0 : i32
    %c0_i32_0 = arith.constant 0 : i32
    %c0_i32_1 = arith.constant 0 : i32
    return %arg0, %c0_i32, %c0_i32_0 : i32, i32, i32
  }
}

</mosaic_0001>

<bundles_post_ra>
// kernel: tile.18
= control target key start
LH: loop header
LB: loop body
LE: loop exit
PB: predicated region body
PF: predicated region fallthrough
CT: control target
= control target key end

     0   :  { %s22_s0 = inlined_call_operand.vmem [shape: f32[8], index: 0, kind: input, shape index: {}]   ;;  %s23_s1 = inlined_call_operand.vmem [shape: f32[8,8], index: 1, kind: output, shape index: {}]  }
   0x1   :  { %v4_v0 = vld [vmem:[%s22_s0] ss:$0 sm:$0xff] }
   0x2   :  { %5 = vst [vmem:[%s23_s1] sm:$0xff] %v4_v0 }

// kernel: tile.19
= control target key start
LH: loop header
LB: loop body
LE: loop exit
PB: predicated region body
PF: predicated region fallthrough
CT: control target
= control target key end

     0   :  { %s67_s10 = smov 56   ;;  %s68_s11 = smov 40   ;;  %vm3_vm0 = vcmask 64512   ;;  %vm9_vm1 = vcmask 523712   ;;  %vm15_vm2 = vcmask 458112   ;;  %vm21_vm3 = vcmask 392512   ;;  %s111_s0 = inlined_call_operand.vmem [shape: f32[8,8], index: 0, kind: input, shape index: {}]   ;;  %s112_s1 = inlined_call_operand.vmem [shape: f32[1,64], index: 1, kind: output, shape index: {}]  }
   0x1   :  { %v53_v0 = vld [vmem:[%s111_s0 + $0x7] sm:$0x1]   ;;  %v55_v1 = vld [vmem:[%s111_s0 + $0x5] sm:$0x1]   ;;  %v57_v2 = vld [vmem:[%s111_s0 + $0x3] sm:$0x1]  }
   0x2   :  { %7 = vrot.lane.b32.xlu0 %v53_v0, %s67_s10  ;;  %19 = vrot.lane.b32.xlu1 %v55_v1, %s68_s11  ;;  %s69_s14 = smov 24   ;;  %v54_v3 = vld [vmem:[%s111_s0 + $0x6] sm:$0x1]   ;;  %v56_v4 = vld [vmem:[%s111_s0 + $0x4] sm:$0x1]   ;;  %s70_s21 = smov 48  }
   0x3   :  { %31 = vrot.lane.b32.xlu2 %v57_v2, %s69_s14  ;;  %v58_v5 = vld [vmem:[%s111_s0 + $0x2] sm:$0x1]   ;;  %s71_s22 = smov 32   ;;  %s72_s23 = smov 16   ;;  %v59_v6 = vld [vmem:[%s111_s0 + $0x1] sm:$0x1]  }
   0x4   :  { %s73_s26 = smov 8   ;;  %v2_v7 = vld [vmem:[%s111_s0] sm:$0x1]   ;;  %vm27_vm4 = vcmask 326912   ;;  %vm33_vm5 = vcmask 261312   ;;  %vm39_vm6 = vcmask 195712  }
   0x5   :  { %4 = vst.msk [vmem:[#allocation0] sm:$0x1] %vm3_vm0, %v2_v7   ;;  %vm45_vm7 = vcmask 130112  }
   0xa   :  { %13 = vrot.lane.b32.xlu0 %v54_v3, %s70_s21  ;;  %25 = vrot.lane.b32.xlu1 %v56_v4, %s71_s22 }
   0xb   :  { %37 = vrot.lane.b32.xlu2 %v58_v5, %s72_s23 }
  0x12   :  { %43 = vrot.lane.b32.xlu0 %v59_v6, %s73_s26 }
  0x5d   :  { %v32_v8 = vpop.permute.xlu2 %31  }
  0x65   :  { %v38_v9 = vpop.permute.xlu2 %37  }
  0x74   :  { %v8_v10 = vpop.permute.xlu0 %7   ;;  %v20_v11 = vpop.permute.xlu1 %19  }
  0x75   :  { %10 = vst.msk [vmem:[#allocation0] sm:$0x1] %vm9_vm1, %v8_v10  }
  0x7c   :  { %v14_v12 = vpop.permute.xlu0 %13   ;;  %v26_v13 = vpop.permute.xlu1 %25  }
  0x7d   :  { %16 = vst.msk [vmem:[#allocation0] sm:$0x1] %vm15_vm2, %v14_v12  }
  0x7e   :  { %22 = vst.msk [vmem:[#allocation0] sm:$0x1] %vm21_vm3, %v20_v11  }
  0x7f   :  { %28 = vst.msk [vmem:[#allocation0] sm:$0x1] %vm27_vm4, %v26_v13  }
  0x80   :  { %34 = vst.msk [vmem:[#allocation0] sm:$0x1] %vm33_vm5, %v32_v8  }
  0x81   :  { %40 = vst.msk [vmem:[#allocation0] sm:$0x1] %vm39_vm6, %v38_v9  }
  0x84   :  { %v44_v14 = vpop.permute.xlu0 %43  }
  0x85   :  { %46 = vst.msk [vmem:[#allocation0] sm:$0x1] %vm45_vm7, %v44_v14  }
  0x8c   :  { %v49_v15 = vld [vmem:[#allocation0] sm:$0x1] }
  0x8d   :  { %52 = vst [vmem:[%s112_s1] sm:$0x1] %v49_v15 }

// kernel: down_conv_block.1
= control target key start
LH: loop header
LB: loop body
LE: loop exit
PB: predicated region body
PF: predicated region fallthrough
CT: control target
= control target key end

     0   :  { %vm32_vm0 = vcmask 130048   ;;  %vm56_vm1 = vcmask 516096   ;;  %v668_v14 = vmov 0.0   ;;  %vm59_vm2 = vcmask 523264   ;;  %s1037_s1 = inlined_call_operand.vmem [shape: f32[2,16,64], index: 1, kind: input, shape index: {}]   ;;  %s1038_s0 = inlined_call_operand.vmem [shape: f32[8,16], index: 0, kind: input, shape index: {}]   ;;  %s1039_s2 = inlined_call_operand.vmem [shape: f32[3,64,64], index: 2, kind: input, shape index: {}]   ;;  %s1040_s5 = inlined_call_operand.vmem [shape: f32[1,64], index: 5, kind: input, shape index: {}]   ;;  %s1041_s6 = inlined_call_operand.vmem [shape: f32[1,64], index: 6, kind: input, shape index: {}]   ;;  %s1042_s3 = inlined_call_operand.vmem [shape: f32[3,64,64], index: 3, kind: input, shape index: {}]   ;;  %s1043_s7 = inlined_call_operand.vmem [shape: f32[1,64], index: 7, kind: input, shape index: {}]   ;;  %s1044_s4 = inlined_call_operand.vmem [shape: f32[3,64,64], index: 4, kind: input, shape index: {}]   ;;  %s1045_s8 = inlined_call_operand.vmem [shape: f32[2,8,64], index: 8, kind: output, shape index: {}]  }
   0x1   :  { %v31_v0 = vld [vmem:[%s1037_s1 + $0x8] sm:$0xff]  ;;  %v577_v1 = vld [vmem:[%s1037_s1 + $0x18] sm:$0xff]  ;;  %v30_v2 = vld [vmem:[%s1037_s1] sm:$0xff]  ;;  %58 = vst.msk [vmem:[#allocation2 + $0x9] sm:$0x1] %vm56_vm1, %v668_v14  ;;  %vm199_vm3 = vcmask 1045504  }
   0x2   :  { %50 = vmatpush.msra.mxu0 %v31_v0  ;;  %78 = vmatpush.msra.mxu1 %v577_v1  ;;  %v576_v3 = vld [vmem:[%s1037_s1 + $0x10] sm:$0xff]  ;;  %v29_v4 = vld [vmem:[%s1038_s0] sm:$0xff]  ;;  %v101_v5 = vld [vmem:[%s1039_s2 + $0x38] sm:$0xff]  ;;  %84 = vst.msk [vmem:[#allocation2 + $0xa] sm:$0x1] %vm56_vm1, %v668_v14  ;;  %vm149_vm4 = vcmask 1046528  }
   0x3   :  { %656 = vmatpush.msra.mxu3 %v101_v5  ;;  %v100_v6 = vld [vmem:[%s1039_s2 + $0x30] sm:$0xff]  ;;  %119 = vmatpush.msra.mxu2 %v101_v5  ;;  %v600_v7 = vld [vmem:[%s1039_s2 + $0xb8] sm:$0xff]  ;;  %v99_v8 = vld [vmem:[%s1039_s2 + $0x28] sm:$0xff]  ;;  %57 = vst.msk [vmem:[#allocation2] sm:$0x1] %vm56_vm1, %v668_v14  ;;  %vm248_vm5 = vcmask 523266  }
   0x4   :  { %51 = vmatpush.msra.mxu0 %v30_v2  ;;  %79 = vmatpush.msra.mxu1 %v576_v3  ;;  %v599_v9 = vld [vmem:[%s1039_s2 + $0xb0] sm:$0xff]  ;;  %v98_v10 = vld [vmem:[%s1039_s2 + $0x20] sm:$0xff]  ;;  %v97_v11 = vld [vmem:[%s1039_s2 + $0x18] sm:$0xff]  ;;  %85 = vst.msk [vmem:[#allocation2 + $0x13] sm:$0x1] %vm56_vm1, %v668_v14  ;;  %vm250_vm6 = vcmask 517120  }
   0x5   :  { %575 = vmatmul.msk.f32.vlgmr.msra.gmra.mxu0 %vm32_vm0, %v29_v4  ;;  %578 = vmatmul.msk.f32.vlgmr.msra.gmra.mxu1 %vm32_vm0, %v29_v4  ;;  %v96_v12 = vld [vmem:[%s1039_s2 + $0x10] sm:$0xff]  ;;  %v95_v13 = vld [vmem:[%s1039_s2 + $0x8] sm:$0xff]  ;;  %v94_v15 = vld [vmem:[%s1039_s2] sm:$0xff] }
   0x6   :  { %657 = vmatpush.msra.mxu3 %v100_v6  ;;  %120 = vmatpush.msra.mxu2 %v100_v6  ;;  %v598_v16 = vld [vmem:[%s1039_s2 + $0xa8] sm:$0xff]  ;;  %v589_v17 = vld [vmem:[%s1039_s2 + $0x78] sm:$0xff]  ;;  %v597_v18 = vld [vmem:[%s1039_s2 + $0xa0] sm:$0xff] }
   0x7   :  { %219 = vmatpush.msrb.mxu0 %v600_v7  ;;  %v588_v19 = vld [vmem:[%s1039_s2 + $0x70] sm:$0xff]  ;;  %v596_v20 = vld [vmem:[%s1039_s2 + $0x98] sm:$0xff]  ;;  %v587_v21 = vld [vmem:[%s1039_s2 + $0x68] sm:$0xff] }
   0x8   :  { %658 = vmatpush.msra.mxu3 %v99_v8  ;;  %121 = vmatpush.msra.mxu2 %v99_v8  ;;  %v595_v22 = vld [vmem:[%s1039_s2 + $0x90] sm:$0xff]  ;;  %v586_v23 = vld [vmem:[%s1039_s2 + $0x60] sm:$0xff]  ;;  %v594_v24 = vld [vmem:[%s1039_s2 + $0x88] sm:$0xff] }
   0x9   :  { %220 = vmatpush.msrb.mxu0 %v599_v9  ;;  %v585_v25 = vld [vmem:[%s1039_s2 + $0x58] sm:$0xff]  ;;  %v593_v26 = vld [vmem:[%s1039_s2 + $0x80] sm:$0xff]  ;;  %v584_v27 = vld [vmem:[%s1039_s2 + $0x50] sm:$0xff] }
   0xa   :  { %659 = vmatpush.msra.mxu3 %v98_v10  ;;  %122 = vmatpush.msra.mxu2 %v98_v10  ;;  %v583_v28 = vld [vmem:[%s1039_s2 + $0x48] sm:$0xff]  ;;  %v582_v29 = vld [vmem:[%s1039_s2 + $0x40] sm:$0xff]  ;;  %v266_v45 = vld [vmem:[%s1042_s3 + $0x38] sm:$0xff] }
   0xb   :  { %221 = vmatpush.msrb.mxu0 %v598_v16  ;;  %284 = vmatpush.msrb.mxu1 %v266_v45  ;;  %v265_v46 = vld [vmem:[%s1042_s3 + $0x30] sm:$0xff]  ;;  %v264_v47 = vld [vmem:[%s1042_s3 + $0x28] sm:$0xff]  ;;  %v263_v48 = vld [vmem:[%s1042_s3 + $0x20] sm:$0xff] }
   0xc   :  { %660 = vmatpush.msra.mxu3 %v97_v11  ;;  %123 = vmatpush.msra.mxu2 %v97_v11  ;;  %v625_v49 = vld [vmem:[%s1042_s3 + $0xb8] sm:$0xff]  ;;  %v624_v50 = vld [vmem:[%s1042_s3 + $0xb0] sm:$0xff]  ;;  %v260_v54 = vld [vmem:[%s1042_s3 + $0x8] sm:$0xff] }
   0xd   :  { %222 = vmatpush.msrb.mxu0 %v597_v18  ;;  %285 = vmatpush.msrb.mxu1 %v265_v46  ;;  %v262_v51 = vld [vmem:[%s1042_s3 + $0x18] sm:$0xff]  ;;  %v261_v52 = vld [vmem:[%s1042_s3 + $0x10] sm:$0xff]  ;;  %v259_v56 = vld [vmem:[%s1042_s3] sm:$0xff] }
   0xe   :  { %661 = vmatpush.msra.mxu3 %v96_v12  ;;  %124 = vmatpush.msra.mxu2 %v96_v12  ;;  %v614_v53 = vld [vmem:[%s1042_s3 + $0x78] sm:$0xff]  ;;  %v613_v55 = vld [vmem:[%s1042_s3 + $0x70] sm:$0xff]  ;;  %v623_v57 = vld [vmem:[%s1042_s3 + $0xa8] sm:$0xff] }
   0xf   :  { %223 = vmatpush.msrb.mxu0 %v596_v20  ;;  %286 = vmatpush.msrb.mxu1 %v264_v47  ;;  %v622_v58 = vld [vmem:[%s1042_s3 + $0xa0] sm:$0xff]  ;;  %v612_v59 = vld [vmem:[%s1042_s3 + $0x68] sm:$0xff]  ;;  %v621_v61 = vld [vmem:[%s1042_s3 + $0x98] sm:$0xff] }
  0x10   :  { %662 = vmatpush.msra.mxu3 %v95_v13  ;;  %125 = vmatpush.msra.mxu2 %v95_v13  ;;  %v611_v60 = vld [vmem:[%s1042_s3 + $0x60] sm:$0xff]  ;;  %v610_v62 = vld [vmem:[%s1042_s3 + $0x58] sm:$0xff]  ;;  %v620_v63 = vld [vmem:[%s1042_s3 + $0x90] sm:$0xff] }
  0x11   :  { %224 = vmatpush.msrb.mxu0 %v595_v22  ;;  %287 = vmatpush.msrb.mxu1 %v263_v48  ;;  %v609_v0 = vld [vmem:[%s1042_s3 + $0x50] sm:$0xff]  ;;  %v608_v1 = vld [vmem:[%s1042_s3 + $0x48] sm:$0xff]  ;;  %v607_v4 = vld [vmem:[%s1042_s3 + $0x40] sm:$0xff] }
  0x12   :  { %663 = vmatpush.msra.mxu3 %v94_v15  ;;  %126 = vmatpush.msra.mxu2 %v94_v15  ;;  %v619_v2 = vld [vmem:[%s1042_s3 + $0x88] sm:$0xff]  ;;  %v618_v5 = vld [vmem:[%s1042_s3 + $0x80] sm:$0xff]  ;;  %v649_v45 = vld [vmem:[%s1044_s4 + $0xb0] sm:$0xff] }
  0x13   :  { %225 = vmatpush.msrb.mxu0 %v594_v24  ;;  %288 = vmatpush.msrb.mxu1 %v262_v51  ;;  %v665_v7 = vld [vmem:[%s1040_s5] ss:$0 sm:$0xff]  ;;  %v639_v46 = vld [vmem:[%s1044_s4 + $0x78] sm:$0xff]  ;;  %v422_v48 = vld [vmem:[%s1044_s4 + $0x10] sm:$0xff] }
  0x14   :  { %169 = vmatpush.msrb.mxu3 %v589_v17  ;;  %333 = vmatpush.msrb.mxu2 %v614_v53  ;;  %v423_v47 = vld [vmem:[%s1044_s4 + $0x18] sm:$0xff]  ;;  %v420_v51 = vld [vmem:[%s1044_s4] sm:$0xff] }
  0x15   :  { %226 = vmatpush.msrb.mxu0 %v593_v26  ;;  %289 = vmatpush.msrb.mxu1 %v261_v52  ;;  %v648_v52 = vld [vmem:[%s1044_s4 + $0xa8] sm:$0xff]  ;;  %v647_v53 = vld [vmem:[%s1044_s4 + $0xa0] sm:$0xff] }
  0x16   :  { %170 = vmatpush.msrb.mxu3 %v588_v19  ;;  %334 = vmatpush.msrb.mxu2 %v613_v55  ;;  %v636_v55 = vld [vmem:[%s1044_s4 + $0x60] sm:$0xff] }
  0x17   :  { %290 = vmatpush.msrb.mxu1 %v260_v54  ;;  %v637_v54 = vld [vmem:[%s1044_s4 + $0x68] sm:$0xff] }
  0x18   :  { %171 = vmatpush.msrb.mxu3 %v587_v21  ;;  %335 = vmatpush.msrb.mxu2 %v612_v59  ;;  %v634_v59 = vld [vmem:[%s1044_s4 + $0x50] sm:$0xff] }
  0x19   :  { %291 = vmatpush.msrb.mxu1 %v259_v56  ;;  %v646_v56 = vld [vmem:[%s1044_s4 + $0x98] sm:$0xff] }
  0x1a   :  { %172 = vmatpush.msrb.mxu3 %v586_v23  ;;  %336 = vmatpush.msrb.mxu2 %v611_v60  ;;  %v644_v60 = vld [vmem:[%s1044_s4 + $0x88] sm:$0xff] }
  0x1b   :  { %494 = vmatpush.msra.mxu1 %v639_v46 }
  0x1c   :  { %173 = vmatpush.msrb.mxu3 %v585_v25  ;;  %337 = vmatpush.msrb.mxu2 %v610_v62  ;;  %v643_v62 = vld [vmem:[%s1044_s4 + $0x80] sm:$0xff] }
  0x1e   :  { %174 = vmatpush.msrb.mxu3 %v584_v27  ;;  %338 = vmatpush.msrb.mxu2 %v609_v0  ;;  %v632_v0 = vld [vmem:[%s1044_s4 + $0x40] sm:$0xff] }
  0x20   :  { %175 = vmatpush.msrb.mxu3 %v583_v28  ;;  %339 = vmatpush.msrb.mxu2 %v608_v1  ;;  %v666_v1 = vld [vmem:[%s1041_s6] ss:$0 sm:$0xff] }
  0x22   :  { %176 = vmatpush.msrb.mxu3 %v582_v29  ;;  %340 = vmatpush.msrb.mxu2 %v607_v4 }
  0x82   :  { %v53_v30 = vpop.f32.mrf.mxu0  ;;  %v81_v31 = vpop.f32.mrf.mxu1 }
  0x83   :  { %60 = vst.msk [vmem:[#allocation2 + $0x1] sm:$0xff] %vm59_vm2, %v53_v30 }
  0x84   :  { %86 = vst.msk [vmem:[#allocation2 + $0xb] sm:$0xff] %vm59_vm2, %v81_v31 }
  0x8a   :  { %v87_v32 = vld [vmem:[#allocation2] sm:$0xff] }
  0x8b   :  { %v88_v33 = vld [vmem:[#allocation2 + $0x8] sm:$0xff]  ;;  %579 = vmatmul.msk.f32.vlgmr.msra.gmra.mxu2 %vm59_vm2, %v87_v32  ;;  %243 = vst.msk [vmem:[#allocation2] sm:$0x1] %vm56_vm1, %v668_v14  ;;  %v89_v34 = vld [vmem:[#allocation2 + $0x10] sm:$0xf]  ;;  %v200_v35 = vrot.slane %v87_v32, 2 }
  0x8c   :  { %244 = vst.msk [vmem:[#allocation2 + $0x9] sm:$0x1] %vm56_vm1, %v668_v14  ;;  %581 = vmatmul.msk.f32.vlgmr.msra.gmra.mxu3 %vm59_vm2, %v89_v34  ;;  %v201_v36 = vrot.slane %v88_v33, 2  ;;  %v150_v38 = vrot.slane %v87_v32, 1  ;;  %v151_v39 = vrot.slane %v88_v33, 1  ;;  %v203_v40 = vrot.slane %v89_v34, 2 }
  0x8d   :  { %246 = vst.msk [vmem:[#allocation2 + $0xa] sm:$0x1] %vm56_vm1, %v668_v14  ;;  %v153_v43 = vrot.slane %v89_v34, 1  ;;  %382 = vmatpush.msra.mxu3 %v625_v49  ;;  %v421_v49 = vld [vmem:[%s1044_s4 + $0x8] sm:$0xff] }
  0x8e   :  { %247 = vst.msk [vmem:[#allocation2 + $0x13] sm:$0x1] %vm56_vm1, %v668_v14  ;;  %v202_v37 = vsel %vm199_vm3, %v200_v35, %v201_v36  ;;  %v152_v41 = vsel %vm149_vm4, %v150_v38, %v151_v39  ;;  %v204_v42 = vsel %vm199_vm3, %v201_v36, %v203_v40 }
  0x8f   :  { %601 = vmatmul.msk.f32.vlgmr.msrb.gmra.mxu0 %vm59_vm2, %v202_v37  ;;  %v154_v44 = vsel %vm149_vm4, %v151_v39, %v153_v43  ;;  %383 = vmatpush.msra.mxu3 %v624_v50  ;;  %v638_v50 = vld [vmem:[%s1044_s4 + $0x70] sm:$0xff] }
  0x90   :  { %495 = vmatpush.msra.mxu1 %v638_v50 }
  0x91   :  { %384 = vmatpush.msra.mxu3 %v623_v57  ;;  %v635_v57 = vld [vmem:[%s1044_s4 + $0x58] sm:$0xff] }
  0x92   :  { %496 = vmatpush.msra.mxu1 %v637_v54 }
  0x93   :  { %580 = vmatmul.msk.f32.gmra.mxu2 %vm59_vm2, %v88_v33  ;;  %385 = vmatpush.msra.mxu3 %v622_v58  ;;  %v645_v58 = vld [vmem:[%s1044_s4 + $0x90] sm:$0xff] }
  0x94   :  { %590 = vmatmul.msk.f32.vlgmr.msrb.gmra.mxu3 %vm59_vm2, %v152_v41  ;;  %v427_v41 = vld [vmem:[%s1044_s4 + $0x38] sm:$0xff]  ;;  %497 = vmatpush.msra.mxu1 %v636_v55 }
  0x95   :  { %386 = vmatpush.msra.mxu3 %v621_v61  ;;  %445 = vmatpush.msra.mxu0 %v427_v41  ;;  %v633_v61 = vld [vmem:[%s1044_s4 + $0x48] sm:$0xff] }
  0x96   :  { %498 = vmatpush.msra.mxu1 %v635_v57 }
  0x97   :  { %602 = vmatmul.msk.f32.gmra.mxu0 %vm59_vm2, %v204_v42  ;;  %387 = vmatpush.msra.mxu3 %v620_v63  ;;  %v425_v42 = vld [vmem:[%s1044_s4 + $0x28] sm:$0xff] }
  0x98   :  { %499 = vmatpush.msra.mxu1 %v634_v59 }
  0x99   :  { %388 = vmatpush.msra.mxu3 %v619_v2 }
  0x9a   :  { %500 = vmatpush.msra.mxu1 %v633_v61 }
  0x9b   :  { %389 = vmatpush.msra.mxu3 %v618_v5 }
  0x9c   :  { %591 = vmatmul.msk.f32.gmra.mxu3 %vm59_vm2, %v154_v44  ;;  %v650_v44 = vld [vmem:[%s1044_s4 + $0xb8] sm:$0xff]  ;;  %501 = vmatpush.msra.mxu1 %v632_v0 }
  0x9d   :  { %543 = vmatpush.msra.mxu2 %v650_v44 }
  0x9f   :  { %603 = vmatmul.msk.f32.gmra.mxu0 %vm59_vm2, %v203_v40  ;;  %544 = vmatpush.msra.mxu2 %v649_v45 }
  0xa1   :  { %545 = vmatpush.msra.mxu2 %v648_v52 }
  0xa3   :  { %546 = vmatpush.msra.mxu2 %v647_v53 }
  0xa4   :  { %592 = vmatmul.msk.f32.gmra.mxu3 %vm59_vm2, %v153_v43  ;;  %v424_v43 = vld [vmem:[%s1044_s4 + $0x20] sm:$0xff] }
  0xa5   :  { %547 = vmatpush.msra.mxu2 %v646_v56 }
  0xa7   :  { %548 = vmatpush.msra.mxu2 %v645_v58 }
  0xa9   :  { %549 = vmatpush.msra.mxu2 %v644_v60 }
  0xab   :  { %550 = vmatpush.msra.mxu2 %v643_v62 }
 0x10c   :  { %v228_v9 = vpop.f32.mrf.mxu0 }
 0x10e   :  { %v128_v6 = vpop.f32.mrf.mxu2 }
 0x10f   :  { %v134_v3 = vpop.f32.mrf.mxu3  ;;  %v137_v8 = vadd.f32 %v665_v7, %v128_v6 }
 0x110   :  { %v139_v23 = vadd.f32 %v665_v7, %v134_v3 }
 0x114   :  { %v231_v17 = vpop.f32.mrf.mxu0 }
 0x116   :  { %v131_v13 = vpop.f32.mrf.mxu2 }
 0x117   :  { %v178_v10 = vpop.f32.mrf.mxu3  ;;  %v138_v16 = vadd.f32 %v665_v7, %v131_v13 }
 0x118   :  { %v187_v11 = vadd.f32 %v178_v10, %v137_v8 }
 0x11a   :  { %v237_v12 = vadd.f32 %v228_v9, %v187_v11 }
 0x11c   :  { %v240_v15 = vmax.f32 %v237_v12, 0.0  ;;  %v234_v26 = vpop.f32.mrf.mxu0 }
 0x11e   :  { %245 = vst.msk [vmem:[#allocation2 + $0x1] sm:$0xff] %vm59_vm2, %v240_v15 }
 0x11f   :  { %v181_v18 = vpop.f32.mrf.mxu3 }
 0x120   :  { %v188_v19 = vadd.f32 %v181_v18, %v138_v16 }
 0x122   :  { %v238_v20 = vadd.f32 %v231_v17, %v188_v19 }
 0x124   :  { %v241_v21 = vmax.f32 %v238_v20, 0.0 }
 0x125   :  { %v252_v22 = vld [vmem:[#allocation2] sm:$0xff] }
 0x126   :  { %249 = vst.msk [vmem:[#allocation2 + $0x9] sm:$0xfc] %vm248_vm5, %v241_v21  ;;  %604 = vmatmul.msk.f32.vlgmr.msrb.gmra.mxu1 %vm59_vm2, %v252_v22  ;;  %v314_v30 = vrot.slane %v252_v22, 1  ;;  %v363_v32 = vrot.slane %v252_v22, 2 }
 0x127   :  { %406 = vst.msk [vmem:[#allocation2] sm:$0x1] %vm56_vm1, %v668_v14  ;;  %v184_v24 = vpop.f32.mrf.mxu3 }
 0x128   :  { %v189_v25 = vadd.f32 %v184_v24, %v139_v23 }
 0x12a   :  { %v239_v27 = vadd.f32 %v234_v26, %v189_v25 }
 0x12c   :  { %v242_v28 = vmax.f32 %v239_v27, 0.0 }
 0x12d   :  { %v253_v29 = vld [vmem:[#allocation2 + $0x8] sm:$0xff] }
 0x12e   :  { %251 = vst.msk [vmem:[#allocation2 + $0x11] sm:$0x3] %vm250_vm6, %v242_v28  ;;  %605 = vmatmul.msk.f32.gmra.mxu1 %vm59_vm2, %v253_v29  ;;  %v315_v31 = vrot.slane %v253_v29, 1  ;;  %v364_v33 = vrot.slane %v253_v29, 2 }
 0x12f   :  { %407 = vst.msk [vmem:[#allocation2 + $0x9] sm:$0x1] %vm56_vm1, %v668_v14 }
 0x130   :  { %409 = vst.msk [vmem:[#allocation2 + $0xa] sm:$0x1] %vm56_vm1, %v668_v14  ;;  %v316_v34 = vsel %vm149_vm4, %v314_v30, %v315_v31  ;;  %v365_v35 = vsel %vm199_vm3, %v363_v32, %v364_v33 }
 0x131   :  { %615 = vmatmul.msk.f32.vlgmr.msrb.gmra.mxu2 %vm59_vm2, %v316_v34  ;;  %626 = vmatmul.msk.f32.vlgmr.msra.gmra.mxu3 %vm59_vm2, %v365_v35 }
 0x135   :  { %v254_v36 = vld [vmem:[#allocation2 + $0x10] sm:$0xf] }
 0x136   :  { %606 = vmatmul.msk.f32.gmra.mxu1 %vm59_vm2, %v254_v36  ;;  %410 = vst.msk [vmem:[#allocation2 + $0x13] sm:$0x1] %vm56_vm1, %v668_v14  ;;  %v317_v37 = vrot.slane %v254_v36, 1  ;;  %v366_v38 = vrot.slane %v254_v36, 2  ;;  %v426_v14 = vld [vmem:[%s1044_s4 + $0x30] sm:$0xff] }
 0x137   :  { %446 = vmatpush.msra.mxu0 %v426_v14 }
 0x138   :  { %v318_v39 = vsel %vm149_vm4, %v315_v31, %v317_v37  ;;  %v367_v40 = vsel %vm199_vm3, %v364_v33, %v366_v38 }
 0x139   :  { %616 = vmatmul.msk.f32.gmra.mxu2 %vm59_vm2, %v318_v39  ;;  %627 = vmatmul.msk.f32.gmra.mxu3 %vm59_vm2, %v367_v40 }
 0x13a   :  { %447 = vmatpush.msra.mxu0 %v425_v42 }
 0x13c   :  { %448 = vmatpush.msra.mxu0 %v424_v43 }
 0x13e   :  { %449 = vmatpush.msra.mxu0 %v423_v47 }
 0x140   :  { %450 = vmatpush.msra.mxu0 %v422_v48 }
 0x141   :  { %617 = vmatmul.msk.f32.gmra.mxu2 %vm59_vm2, %v317_v37  ;;  %628 = vmatmul.msk.f32.gmra.mxu3 %vm59_vm2, %v366_v38  ;;  %v667_v37 = vld [vmem:[%s1043_s7] ss:$0 sm:$0xff] }
 0x142   :  { %451 = vmatpush.msra.mxu0 %v421_v49 }
 0x144   :  { %452 = vmatpush.msra.mxu0 %v420_v51 }
 0x1a3   :  { %v293_v63 = vpop.f32.mrf.mxu1 }
 0x1a4   :  { %v302_v2 = vadd.f32 %v666_v1, %v293_v63 }
 0x1ab   :  { %v296_v6 = vpop.f32.mrf.mxu1 }
 0x1ac   :  { %v303_v9 = vadd.f32 %v666_v1, %v296_v6 }
 0x1b3   :  { %v299_v15 = vpop.f32.mrf.mxu1 }
 0x1b4   :  { %v342_v3 = vpop.f32.mrf.mxu2  ;;  %v391_v4 = vpop.f32.mrf.mxu3  ;;  %v304_v18 = vadd.f32 %v666_v1, %v299_v15 }
 0x1b5   :  { %v351_v5 = vadd.f32 %v342_v3, %v302_v2 }
 0x1b7   :  { %v400_v7 = vadd.f32 %v391_v4, %v351_v5 }
 0x1b9   :  { %v403_v8 = vmax.f32 %v400_v7, 0.0 }
 0x1bb   :  { %408 = vst.msk [vmem:[#allocation2 + $0x1] sm:$0xff] %vm59_vm2, %v403_v8 }
 0x1bc   :  { %v345_v10 = vpop.f32.mrf.mxu2  ;;  %v394_v11 = vpop.f32.mrf.mxu3 }
 0x1bd   :  { %v352_v12 = vadd.f32 %v345_v10, %v303_v9 }
 0x1bf   :  { %v401_v13 = vadd.f32 %v394_v11, %v352_v12 }
 0x1c1   :  { %v404_v16 = vmax.f32 %v401_v13, 0.0 }
 0x1c2   :  { %v413_v17 = vld [vmem:[#allocation2] sm:$0xff] }
 0x1c3   :  { %411 = vst.msk [vmem:[#allocation2 + $0x9] sm:$0xfc] %vm248_vm5, %v404_v16  ;;  %629 = vmatmul.msk.f32.vlgmr.msra.gmra.mxu0 %vm59_vm2, %v413_v17  ;;  %v475_v25 = vrot.slane %v413_v17, 1  ;;  %v524_v26 = vrot.slane %v413_v17, 2 }
 0x1c4   :  { %v348_v19 = vpop.f32.mrf.mxu2  ;;  %v397_v21 = vpop.f32.mrf.mxu3 }
 0x1c5   :  { %v353_v20 = vadd.f32 %v348_v19, %v304_v18 }
 0x1c7   :  { %v402_v22 = vadd.f32 %v397_v21, %v353_v20 }
 0x1c9   :  { %v405_v23 = vmax.f32 %v402_v22, 0.0 }
 0x1ca   :  { %v414_v24 = vld [vmem:[#allocation2 + $0x8] sm:$0xff] }
 0x1cb   :  { %412 = vst.msk [vmem:[#allocation2 + $0x11] sm:$0x3] %vm250_vm6, %v405_v23  ;;  %630 = vmatmul.msk.f32.gmra.mxu0 %vm59_vm2, %v414_v24  ;;  %v476_v27 = vrot.slane %v414_v24, 1  ;;  %v525_v28 = vrot.slane %v414_v24, 2 }
 0x1cd   :  { %v477_v29 = vsel %vm149_vm4, %v475_v25, %v476_v27  ;;  %v526_v30 = vsel %vm199_vm3, %v524_v26, %v525_v28 }
 0x1ce   :  { %640 = vmatmul.msk.f32.vlgmr.msra.gmra.mxu1 %vm59_vm2, %v477_v29  ;;  %651 = vmatmul.msk.f32.vlgmr.msra.gmra.mxu2 %vm59_vm2, %v526_v30 }
 0x1d2   :  { %v415_v31 = vld [vmem:[#allocation2 + $0x10] sm:$0xf] }
 0x1d3   :  { %631 = vmatmul.msk.f32.gmra.mxu0 %vm59_vm2, %v415_v31  ;;  %v478_v32 = vrot.slane %v415_v31, 1  ;;  %v527_v33 = vrot.slane %v415_v31, 2 }
 0x1d5   :  { %v479_v34 = vsel %vm149_vm4, %v476_v27, %v478_v32  ;;  %v528_v35 = vsel %vm199_vm3, %v525_v28, %v527_v33 }
 0x1d6   :  { %641 = vmatmul.msk.f32.gmra.mxu1 %vm59_vm2, %v479_v34  ;;  %652 = vmatmul.msk.f32.gmra.mxu2 %vm59_vm2, %v528_v35 }
 0x1de   :  { %642 = vmatmul.msk.f32.gmra.mxu1 %vm59_vm2, %v478_v32  ;;  %653 = vmatmul.msk.f32.gmra.mxu2 %vm59_vm2, %v527_v33 }
 0x240   :  { %v454_v36 = vpop.f32.mrf.mxu0 }
 0x241   :  { %v463_v39 = vadd.f32 %v667_v37, %v454_v36 }
 0x248   :  { %v457_v41 = vpop.f32.mrf.mxu0 }
 0x249   :  { %v464_v45 = vadd.f32 %v667_v37, %v457_v41 }
 0x24b   :  { %v503_v38 = vpop.f32.mrf.mxu1 }
 0x24c   :  { %v512_v40 = vadd.f32 %v503_v38, %v463_v39 }
 0x250   :  { %v460_v49 = vpop.f32.mrf.mxu0 }
 0x251   :  { %v552_v14 = vpop.f32.mrf.mxu2  ;;  %v465_v52 = vadd.f32 %v667_v37, %v460_v49 }
 0x252   :  { %v561_v42 = vadd.f32 %v552_v14, %v512_v40 }
 0x253   :  { %v506_v43 = vpop.f32.mrf.mxu1 }
 0x254   :  { %v564_v44 = vmax.f32 %v561_v42, 0.0  ;;  %v513_v46 = vadd.f32 %v506_v43, %v464_v45 }
 0x256   :  { %567 = vst.msk [vmem:[%s1045_s8] sm:$0xff] %vm59_vm2, %v564_v44 }
 0x259   :  { %v555_v47 = vpop.f32.mrf.mxu2 }
 0x25a   :  { %v562_v48 = vadd.f32 %v555_v47, %v513_v46 }
 0x25b   :  { %v509_v51 = vpop.f32.mrf.mxu1 }
 0x25c   :  { %v565_v50 = vmax.f32 %v562_v48, 0.0  ;;  %v514_v53 = vadd.f32 %v509_v51, %v465_v52 }
 0x25e   :  { %654 = vst.msk [vmem:[%s1045_s8 + $0x6] sm:$0xfc] %vm248_vm5, %v565_v50 }
 0x261   :  { %v558_v54 = vpop.f32.mrf.mxu2 }
 0x262   :  { %v563_v55 = vadd.f32 %v558_v54, %v514_v53 }
 0x264   :  { %v566_v56 = vmax.f32 %v563_v55, 0.0 }
 0x266   :  { %655 = vst.msk [vmem:[%s1045_s8 + $0xe] sm:$0x3] %vm250_vm6, %v566_v56 }

// kernel: tile.18
= control target key start
LH: loop header
LB: loop body
LE: loop exit
PB: predicated region body
PF: predicated region fallthrough
CT: control target
= control target key end

     0   :  { %s22_s0 = inlined_call_operand.vmem [shape: f32[8], index: 0, kind: input, shape index: {}]   ;;  %s23_s1 = inlined_call_operand.vmem [shape: f32[8,8], index: 1, kind: output, shape index: {}]  }
   0x1   :  { %v4_v0 = vld [vmem:[%s22_s0] ss:$0 sm:$0xff] }
   0x2   :  { %5 = vst [vmem:[%s23_s1] sm:$0xff] %v4_v0 }

// kernel: tile.19
= control target key start
LH: loop header
LB: loop body
LE: loop exit
PB: predicated region body
PF: predicated region fallthrough
CT: control target
= control target key end

     0   :  { %s67_s10 = smov 56   ;;  %s68_s11 = smov 40   ;;  %vm3_vm0 = vcmask 64512   ;;  %vm9_vm1 = vcmask 523712   ;;  %vm15_vm2 = vcmask 458112   ;;  %vm21_vm3 = vcmask 392512   ;;  %s111_s0 = inlined_call_operand.vmem [shape: f32[8,8], index: 0, kind: input, shape index: {}]   ;;  %s112_s1 = inlined_call_operand.vmem [shape: f32[1,64], index: 1, kind: output, shape index: {}]  }
   0x1   :  { %v53_v0 = vld [vmem:[%s111_s0 + $0x7] sm:$0x1]   ;;  %v55_v1 = vld [vmem:[%s111_s0 + $0x5] sm:$0x1]   ;;  %v57_v2 = vld [vmem:[%s111_s0 + $0x3] sm:$0x1]  }
   0x2   :  { %7 = vrot.lane.b32.xlu0 %v53_v0, %s67_s10  ;;  %19 = vrot.lane.b32.xlu1 %v55_v1, %s68_s11  ;;  %s69_s14 = smov 24   ;;  %v54_v3 = vld [vmem:[%s111_s0 + $0x6] sm:$0x1]   ;;  %v56_v4 = vld [vmem:[%s111_s0 + $0x4] sm:$0x1]   ;;  %s70_s21 = smov 48  }
   0x3   :  { %31 = vrot.lane.b32.xlu2 %v57_v2, %s69_s14  ;;  %v58_v5 = vld [vmem:[%s111_s0 + $0x2] sm:$0x1]   ;;  %s71_s22 = smov 32   ;;  %s72_s23 = smov 16   ;;  %v59_v6 = vld [vmem:[%s111_s0 + $0x1] sm:$0x1]  }
   0x4   :  { %s73_s26 = smov 8   ;;  %v2_v7 = vld [vmem:[%s111_s0] sm:$0x1]   ;;  %vm27_vm4 = vcmask 326912   ;;  %vm33_vm5 = vcmask 261312   ;;  %vm39_vm6 = vcmask 195712  }
   0x5   :  { %4 = vst.msk [vmem:[#allocation0] sm:$0x1] %vm3_vm0, %v2_v7   ;;  %vm45_vm7 = vcmask 130112  }
   0xa   :  { %13 = vrot.lane.b32.xlu0 %v54_v3, %s70_s21  ;;  %25 = vrot.lane.b32.xlu1 %v56_v4, %s71_s22 }
   0xb   :  { %37 = vrot.lane.b32.xlu2 %v58_v5, %s72_s23 }
  0x12   :  { %43 = vrot.lane.b32.xlu0 %v59_v6, %s73_s26 }
  0x5d   :  { %v32_v8 = vpop.permute.xlu2 %31  }
  0x65   :  { %v38_v9 = vpop.permute.xlu2 %37  }
  0x74   :  { %v8_v10 = vpop.permute.xlu0 %7   ;;  %v20_v11 = vpop.permute.xlu1 %19  }
  0x75   :  { %10 = vst.msk [vmem:[#allocation0] sm:$0x1] %vm9_vm1, %v8_v10  }
  0x7c   :  { %v14_v12 = vpop.permute.xlu0 %13   ;;  %v26_v13 = vpop.permute.xlu1 %25  }
  0x7d   :  { %16 = vst.msk [vmem:[#allocation0] sm:$0x1] %vm15_vm2, %v14_v12  }
  0x7e   :  { %22 = vst.msk [vmem:[#allocation0] sm:$0x1] %vm21_vm3, %v20_v11  }
  0x7f   :  { %28 = vst.msk [vmem:[#allocation0] sm:$0x1] %vm27_vm4, %v26_v13  }
  0x80   :  { %34 = vst.msk [vmem:[#allocation0] sm:$0x1] %vm33_vm5, %v32_v8  }
  0x81   :  { %40 = vst.msk [vmem:[#allocation0] sm:$0x1] %vm39_vm6, %v38_v9  }
  0x84   :  { %v44_v14 = vpop.permute.xlu0 %43  }
  0x85   :  { %46 = vst.msk [vmem:[#allocation0] sm:$0x1] %vm45_vm7, %v44_v14  }
  0x8c   :  { %v49_v15 = vld [vmem:[#allocation0] sm:$0x1] }
  0x8d   :  { %52 = vst [vmem:[%s112_s1] sm:$0x1] %v49_v15 }

// kernel: down_conv_block.1
= control target key start
LH: loop header
LB: loop body
LE: loop exit
PB: predicated region body
PF: predicated region fallthrough
CT: control target
= control target key end

     0   :  { %vm32_vm0 = vcmask 130048   ;;  %vm56_vm1 = vcmask 516096   ;;  %v668_v14 = vmov 0.0   ;;  %vm59_vm2 = vcmask 523264   ;;  %s1037_s1 = inlined_call_operand.vmem [shape: f32[2,16,64], index: 1, kind: input, shape index: {}]   ;;  %s1038_s0 = inlined_call_operand.vmem [shape: f32[8,16], index: 0, kind: input, shape index: {}]   ;;  %s1039_s2 = inlined_call_operand.vmem [shape: f32[3,64,64], index: 2, kind: input, shape index: {}]   ;;  %s1040_s5 = inlined_call_operand.vmem [shape: f32[1,64], index: 5, kind: input, shape index: {}]   ;;  %s1041_s6 = inlined_call_operand.vmem [shape: f32[1,64], index: 6, kind: input, shape index: {}]   ;;  %s1042_s3 = inlined_call_operand.vmem [shape: f32[3,64,64], index: 3, kind: input, shape index: {}]   ;;  %s1043_s7 = inlined_call_operand.vmem [shape: f32[1,64], index: 7, kind: input, shape index: {}]   ;;  %s1044_s4 = inlined_call_operand.vmem [shape: f32[3,64,64], index: 4, kind: input, shape index: {}]   ;;  %s1045_s8 = inlined_call_operand.vmem [shape: f32[2,8,64], index: 8, kind: output, shape index: {}]  }
   0x1   :  { %v31_v0 = vld [vmem:[%s1037_s1 + $0x8] sm:$0xff]  ;;  %v577_v1 = vld [vmem:[%s1037_s1 + $0x18] sm:$0xff]  ;;  %v30_v2 = vld [vmem:[%s1037_s1] sm:$0xff]  ;;  %58 = vst.msk [vmem:[#allocation2 + $0x9] sm:$0x1] %vm56_vm1, %v668_v14  ;;  %vm199_vm3 = vcmask 1045504  }
   0x2   :  { %50 = vmatpush.msra.mxu0 %v31_v0  ;;  %78 = vmatpush.msra.mxu1 %v577_v1  ;;  %v576_v3 = vld [vmem:[%s1037_s1 + $0x10] sm:$0xff]  ;;  %v29_v4 = vld [vmem:[%s1038_s0] sm:$0xff]  ;;  %v101_v5 = vld [vmem:[%s1039_s2 + $0x38] sm:$0xff]  ;;  %84 = vst.msk [vmem:[#allocation2 + $0xa] sm:$0x1] %vm56_vm1, %v668_v14  ;;  %vm149_vm4 = vcmask 1046528  }
   0x3   :  { %656 = vmatpush.msra.mxu3 %v101_v5  ;;  %v100_v6 = vld [vmem:[%s1039_s2 + $0x30] sm:$0xff]  ;;  %119 = vmatpush.msra.mxu2 %v101_v5  ;;  %v600_v7 = vld [vmem:[%s1039_s2 + $0xb8] sm:$0xff]  ;;  %v99_v8 = vld [vmem:[%s1039_s2 + $0x28] sm:$0xff]  ;;  %57 = vst.msk [vmem:[#allocation2] sm:$0x1] %vm56_vm1, %v668_v14  ;;  %vm248_vm5 = vcmask 523266  }
   0x4   :  { %51 = vmatpush.msra.mxu0 %v30_v2  ;;  %79 = vmatpush.msra.mxu1 %v576_v3  ;;  %v599_v9 = vld [vmem:[%s1039_s2 + $0xb0] sm:$0xff]  ;;  %v98_v10 = vld [vmem:[%s1039_s2 + $0x20] sm:$0xff]  ;;  %v97_v11 = vld [vmem:[%s1039_s2 + $0x18] sm:$0xff]  ;;  %85 = vst.msk [vmem:[#allocation2 + $0x13] sm:$0x1] %vm56_vm1, %v668_v14  ;;  %vm250_vm6 = vcmask 517120  }
   0x5   :  { %575 = vmatmul.msk.f32.vlgmr.msra.gmra.mxu0 %vm32_vm0, %v29_v4  ;;  %578 = vmatmul.msk.f32.vlgmr.msra.gmra.mxu1 %vm32_vm0, %v29_v4  ;;  %v96_v12 = vld [vmem:[%s1039_s2 + $0x10] sm:$0xff]  ;;  %v95_v13 = vld [vmem:[%s1039_s2 + $0x8] sm:$0xff]  ;;  %v94_v15 = vld [vmem:[%s1039_s2] sm:$0xff] }
   0x6   :  { %657 = vmatpush.msra.mxu3 %v100_v6  ;;  %120 = vmatpush.msra.mxu2 %v100_v6  ;;  %v598_v16 = vld [vmem:[%s1039_s2 + $0xa8] sm:$0xff]  ;;  %v589_v17 = vld [vmem:[%s1039_s2 + $0x78] sm:$0xff]  ;;  %v597_v18 = vld [vmem:[%s1039_s2 + $0xa0] sm:$0xff] }
   0x7   :  { %219 = vmatpush.msrb.mxu0 %v600_v7  ;;  %v588_v19 = vld [vmem:[%s1039_s2 + $0x70] sm:$0xff]  ;;  %v596_v20 = vld [vmem:[%s1039_s2 + $0x98] sm:$0xff]  ;;  %v587_v21 = vld [vmem:[%s1039_s2 + $0x68] sm:$0xff] }
   0x8   :  { %658 = vmatpush.msra.mxu3 %v99_v8  ;;  %121 = vmatpush.msra.mxu2 %v99_v8  ;;  %v595_v22 = vld [vmem:[%s1039_s2 + $0x90] sm:$0xff]  ;;  %v586_v23 = vld [vmem:[%s1039_s2 + $0x60] sm:$0xff]  ;;  %v594_v24 = vld [vmem:[%s1039_s2 + $0x88] sm:$0xff] }
   0x9   :  { %220 = vmatpush.msrb.mxu0 %v599_v9  ;;  %v585_v25 = vld [vmem:[%s1039_s2 + $0x58] sm:$0xff]  ;;  %v593_v26 = vld [vmem:[%s1039_s2 + $0x80] sm:$0xff]  ;;  %v584_v27 = vld [vmem:[%s1039_s2 + $0x50] sm:$0xff] }
   0xa   :  { %659 = vmatpush.msra.mxu3 %v98_v10  ;;  %122 = vmatpush.msra.mxu2 %v98_v10  ;;  %v583_v28 = vld [vmem:[%s1039_s2 + $0x48] sm:$0xff]  ;;  %v582_v29 = vld [vmem:[%s1039_s2 + $0x40] sm:$0xff]  ;;  %v266_v45 = vld [vmem:[%s1042_s3 + $0x38] sm:$0xff] }
   0xb   :  { %221 = vmatpush.msrb.mxu0 %v598_v16  ;;  %284 = vmatpush.msrb.mxu1 %v266_v45  ;;  %v265_v46 = vld [vmem:[%s1042_s3 + $0x30] sm:$0xff]  ;;  %v264_v47 = vld [vmem:[%s1042_s3 + $0x28] sm:$0xff]  ;;  %v263_v48 = vld [vmem:[%s1042_s3 + $0x20] sm:$0xff] }
   0xc   :  { %660 = vmatpush.msra.mxu3 %v97_v11  ;;  %123 = vmatpush.msra.mxu2 %v97_v11  ;;  %v625_v49 = vld [vmem:[%s1042_s3 + $0xb8] sm:$0xff]  ;;  %v624_v50 = vld [vmem:[%s1042_s3 + $0xb0] sm:$0xff]  ;;  %v260_v54 = vld [vmem:[%s1042_s3 + $0x8] sm:$0xff] }
   0xd   :  { %222 = vmatpush.msrb.mxu0 %v597_v18  ;;  %285 = vmatpush.msrb.mxu1 %v265_v46  ;;  %v262_v51 = vld [vmem:[%s1042_s3 + $0x18] sm:$0xff]  ;;  %v261_v52 = vld [vmem:[%s1042_s3 + $0x10] sm:$0xff]  ;;  %v259_v56 = vld [vmem:[%s1042_s3] sm:$0xff] }
   0xe   :  { %661 = vmatpush.msra.mxu3 %v96_v12  ;;  %124 = vmatpush.msra.mxu2 %v96_v12  ;;  %v614_v53 = vld [vmem:[%s1042_s3 + $0x78] sm:$0xff]  ;;  %v613_v55 = vld [vmem:[%s1042_s3 + $0x70] sm:$0xff]  ;;  %v623_v57 = vld [vmem:[%s1042_s3 + $0xa8] sm:$0xff] }
   0xf   :  { %223 = vmatpush.msrb.mxu0 %v596_v20  ;;  %286 = vmatpush.msrb.mxu1 %v264_v47  ;;  %v622_v58 = vld [vmem:[%s1042_s3 + $0xa0] sm:$0xff]  ;;  %v612_v59 = vld [vmem:[%s1042_s3 + $0x68] sm:$0xff]  ;;  %v621_v61 = vld [vmem:[%s1042_s3 + $0x98] sm:$0xff] }
  0x10   :  { %662 = vmatpush.msra.mxu3 %v95_v13  ;;  %125 = vmatpush.msra.mxu2 %v95_v13  ;;  %v611_v60 = vld [vmem:[%s1042_s3 + $0x60] sm:$0xff]  ;;  %v610_v62 = vld [vmem:[%s1042_s3 + $0x58] sm:$0xff]  ;;  %v620_v63 = vld [vmem:[%s1042_s3 + $0x90] sm:$0xff] }
  0x11   :  { %224 = vmatpush.msrb.mxu0 %v595_v22  ;;  %287 = vmatpush.msrb.mxu1 %v263_v48  ;;  %v609_v0 = vld [vmem:[%s1042_s3 + $0x50] sm:$0xff]  ;;  %v608_v1 = vld [vmem:[%s1042_s3 + $0x48] sm:$0xff]  ;;  %v607_v4 = vld [vmem:[%s1042_s3 + $0x40] sm:$0xff] }
  0x12   :  { %663 = vmatpush.msra.mxu3 %v94_v15  ;;  %126 = vmatpush.msra.mxu2 %v94_v15  ;;  %v619_v2 = vld [vmem:[%s1042_s3 + $0x88] sm:$0xff]  ;;  %v618_v5 = vld [vmem:[%s1042_s3 + $0x80] sm:$0xff]  ;;  %v649_v45 = vld [vmem:[%s1044_s4 + $0xb0] sm:$0xff] }
  0x13   :  { %225 = vmatpush.msrb.mxu0 %v594_v24  ;;  %288 = vmatpush.msrb.mxu1 %v262_v51  ;;  %v665_v7 = vld [vmem:[%s1040_s5] ss:$0 sm:$0xff]  ;;  %v639_v46 = vld [vmem:[%s1044_s4 + $0x78] sm:$0xff]  ;;  %v422_v48 = vld [vmem:[%s1044_s4 + $0x10] sm:$0xff] }
  0x14   :  { %169 = vmatpush.msrb.mxu3 %v589_v17  ;;  %333 = vmatpush.msrb.mxu2 %v614_v53  ;;  %v423_v47 = vld [vmem:[%s1044_s4 + $0x18] sm:$0xff]  ;;  %v420_v51 = vld [vmem:[%s1044_s4] sm:$0xff] }
  0x15   :  { %226 = vmatpush.msrb.mxu0 %v593_v26  ;;  %289 = vmatpush.msrb.mxu1 %v261_v52  ;;  %v648_v52 = vld [vmem:[%s1044_s4 + $0xa8] sm:$0xff]  ;;  %v647_v53 = vld [vmem:[%s1044_s4 + $0xa0] sm:$0xff] }
  0x16   :  { %170 = vmatpush.msrb.mxu3 %v588_v19  ;;  %334 = vmatpush.msrb.mxu2 %v613_v55  ;;  %v636_v55 = vld [vmem:[%s1044_s4 + $0x60] sm:$0xff] }
  0x17   :  { %290 = vmatpush.msrb.mxu1 %v260_v54  ;;  %v637_v54 = vld [vmem:[%s1044_s4 + $0x68] sm:$0xff] }
  0x18   :  { %171 = vmatpush.msrb.mxu3 %v587_v21  ;;  %335 = vmatpush.msrb.mxu2 %v612_v59  ;;  %v634_v59 = vld [vmem:[%s1044_s4 + $0x50] sm:$0xff] }
  0x19   :  { %291 = vmatpush.msrb.mxu1 %v259_v56  ;;  %v646_v56 = vld [vmem:[%s1044_s4 + $0x98] sm:$0xff] }
  0x1a   :  { %172 = vmatpush.msrb.mxu3 %v586_v23  ;;  %336 = vmatpush.msrb.mxu2 %v611_v60  ;;  %v644_v60 = vld [vmem:[%s1044_s4 + $0x88] sm:$0xff] }
  0x1b   :  { %494 = vmatpush.msra.mxu1 %v639_v46 }
  0x1c   :  { %173 = vmatpush.msrb.mxu3 %v585_v25  ;;  %337 = vmatpush.msrb.mxu2 %v610_v62  ;;  %v643_v62 = vld [vmem:[%s1044_s4 + $0x80] sm:$0xff] }
  0x1e   :  { %174 = vmatpush.msrb.mxu3 %v584_v27  ;;  %338 = vmatpush.msrb.mxu2 %v609_v0  ;;  %v632_v0 = vld [vmem:[%s1044_s4 + $0x40] sm:$0xff] }
  0x20   :  { %175 = vmatpush.msrb.mxu3 %v583_v28  ;;  %339 = vmatpush.msrb.mxu2 %v608_v1  ;;  %v666_v1 = vld [vmem:[%s1041_s6] ss:$0 sm:$0xff] }
  0x22   :  { %176 = vmatpush.msrb.mxu3 %v582_v29  ;;  %340 = vmatpush.msrb.mxu2 %v607_v4 }
  0x82   :  { %v53_v30 = vpop.f32.mrf.mxu0  ;;  %v81_v31 = vpop.f32.mrf.mxu1 }
  0x83   :  { %60 = vst.msk [vmem:[#allocation2 + $0x1] sm:$0xff] %vm59_vm2, %v53_v30 }
  0x84   :  { %86 = vst.msk [vmem:[#allocation2 + $0xb] sm:$0xff] %vm59_vm2, %v81_v31 }
  0x8a   :  { %v87_v32 = vld [vmem:[#allocation2] sm:$0xff] }
  0x8b   :  { %v88_v33 = vld [vmem:[#allocation2 + $0x8] sm:$0xff]  ;;  %579 = vmatmul.msk.f32.vlgmr.msra.gmra.mxu2 %vm59_vm2, %v87_v32  ;;  %243 = vst.msk [vmem:[#allocation2] sm:$0x1] %vm56_vm1, %v668_v14  ;;  %v89_v34 = vld [vmem:[#allocation2 + $0x10] sm:$0xf]  ;;  %v200_v35 = vrot.slane %v87_v32, 2 }
  0x8c   :  { %244 = vst.msk [vmem:[#allocation2 + $0x9] sm:$0x1] %vm56_vm1, %v668_v14  ;;  %581 = vmatmul.msk.f32.vlgmr.msra.gmra.mxu3 %vm59_vm2, %v89_v34  ;;  %v201_v36 = vrot.slane %v88_v33, 2  ;;  %v150_v38 = vrot.slane %v87_v32, 1  ;;  %v151_v39 = vrot.slane %v88_v33, 1  ;;  %v203_v40 = vrot.slane %v89_v34, 2 }
  0x8d   :  { %246 = vst.msk [vmem:[#allocation2 + $0xa] sm:$0x1] %vm56_vm1, %v668_v14  ;;  %v153_v43 = vrot.slane %v89_v34, 1  ;;  %382 = vmatpush.msra.mxu3 %v625_v49  ;;  %v421_v49 = vld [vmem:[%s1044_s4 + $0x8] sm:$0xff] }
  0x8e   :  { %247 = vst.msk [vmem:[#allocation2 + $0x13] sm:$0x1] %vm56_vm1, %v668_v14  ;;  %v202_v37 = vsel %vm199_vm3, %v200_v35, %v201_v36  ;;  %v152_v41 = vsel %vm149_vm4, %v150_v38, %v151_v39  ;;  %v204_v42 = vsel %vm199_vm3, %v201_v36, %v203_v40 }
  0x8f   :  { %601 = vmatmul.msk.f32.vlgmr.msrb.gmra.mxu0 %vm59_vm2, %v202_v37  ;;  %v154_v44 = vsel %vm149_vm4, %v151_v39, %v153_v43  ;;  %383 = vmatpush.msra.mxu3 %v624_v50  ;;  %v638_v50 = vld [vmem:[%s1044_s4 + $0x70] sm:$0xff] }
  0x90   :  { %495 = vmatpush.msra.mxu1 %v638_v50 }
  0x91   :  { %384 = vmatpush.msra.mxu3 %v623_v57  ;;  %v635_v57 = vld [vmem:[%s1044_s4 + $0x58] sm:$0xff] }
  0x92   :  { %496 = vmatpush.msra.mxu1 %v637_v54 }
  0x93   :  { %580 = vmatmul.msk.f32.gmra.mxu2 %vm59_vm2, %v88_v33  ;;  %385 = vmatpush.msra.mxu3 %v622_v58  ;;  %v645_v58 = vld [vmem:[%s1044_s4 + $0x90] sm:$0xff] }
  0x94   :  { %590 = vmatmul.msk.f32.vlgmr.msrb.gmra.mxu3 %vm59_vm2, %v152_v41  ;;  %v427_v41 = vld [vmem:[%s1044_s4 + $0x38] sm:$0xff]  ;;  %497 = vmatpush.msra.mxu1 %v636_v55 }
  0x95   :  { %386 = vmatpush.msra.mxu3 %v621_v61  ;;  %445 = vmatpush.msra.mxu0 %v427_v41  ;;  %v633_v61 = vld [vmem:[%s1044_s4 + $0x48] sm:$0xff] }
  0x96   :  { %498 = vmatpush.msra.mxu1 %v635_v57 }
  0x97   :  { %602 = vmatmul.msk.f32.gmra.mxu0 %vm59_vm2, %v204_v42  ;;  %387 = vmatpush.msra.mxu3 %v620_v63  ;;  %v425_v42 = vld [vmem:[%s1044_s4 + $0x28] sm:$0xff] }
  0x98   :  { %499 = vmatpush.msra.mxu1 %v634_v59 }
  0x99   :  { %388 = vmatpush.msra.mxu3 %v619_v2 }
  0x9a   :  { %500 = vmatpush.msra.mxu1 %v633_v61 }
  0x9b   :  { %389 = vmatpush.msra.mxu3 %v618_v5 }
  0x9c   :  { %591 = vmatmul.msk.f32.gmra.mxu3 %vm59_vm2, %v154_v44  ;;  %v650_v44 = vld [vmem:[%s1044_s4 + $0xb8] sm:$0xff]  ;;  %501 = vmatpush.msra.mxu1 %v632_v0 }
  0x9d   :  { %543 = vmatpush.msra.mxu2 %v650_v44 }
  0x9f   :  { %603 = vmatmul.msk.f32.gmra.mxu0 %vm59_vm2, %v203_v40  ;;  %544 = vmatpush.msra.mxu2 %v649_v45 }
  0xa1   :  { %545 = vmatpush.msra.mxu2 %v648_v52 }
  0xa3   :  { %546 = vmatpush.msra.mxu2 %v647_v53 }
  0xa4   :  { %592 = vmatmul.msk.f32.gmra.mxu3 %vm59_vm2, %v153_v43  ;;  %v424_v43 = vld [vmem:[%s1044_s4 + $0x20] sm:$0xff] }
  0xa5   :  { %547 = vmatpush.msra.mxu2 %v646_v56 }
  0xa7   :  { %548 = vmatpush.msra.mxu2 %v645_v58 }
  0xa9   :  { %549 = vmatpush.msra.mxu2 %v644_v60 }
  0xab   :  { %550 = vmatpush.msra.mxu2 %v643_v62 }
 0x10c   :  { %v228_v9 = vpop.f32.mrf.mxu0 }
 0x10e   :  { %v128_v6 = vpop.f32.mrf.mxu2 }
 0x10f   :  { %v134_v3 = vpop.f32.mrf.mxu3  ;;  %v137_v8 = vadd.f32 %v665_v7, %v128_v6 }
 0x110   :  { %v139_v23 = vadd.f32 %v665_v7, %v134_v3 }
 0x114   :  { %v231_v17 = vpop.f32.mrf.mxu0 }
 0x116   :  { %v131_v13 = vpop.f32.mrf.mxu2 }
 0x117   :  { %v178_v10 = vpop.f32.mrf.mxu3  ;;  %v138_v16 = vadd.f32 %v665_v7, %v131_v13 }
 0x118   :  { %v187_v11 = vadd.f32 %v178_v10, %v137_v8 }
 0x11a   :  { %v237_v12 = vadd.f32 %v228_v9, %v187_v11 }
 0x11c   :  { %v240_v15 = vmax.f32 %v237_v12, 0.0  ;;  %v234_v26 = vpop.f32.mrf.mxu0 }
 0x11e   :  { %245 = vst.msk [vmem:[#allocation2 + $0x1] sm:$0xff] %vm59_vm2, %v240_v15 }
 0x11f   :  { %v181_v18 = vpop.f32.mrf.mxu3 }
 0x120   :  { %v188_v19 = vadd.f32 %v181_v18, %v138_v16 }
 0x122   :  { %v238_v20 = vadd.f32 %v231_v17, %v188_v19 }
 0x124   :  { %v241_v21 = vmax.f32 %v238_v20, 0.0 }
 0x125   :  { %v252_v22 = vld [vmem:[#allocation2] sm:$0xff] }
 0x126   :  { %249 = vst.msk [vmem:[#allocation2 + $0x9] sm:$0xfc] %vm248_vm5, %v241_v21  ;;  %604 = vmatmul.msk.f32.vlgmr.msrb.gmra.mxu1 %vm59_vm2, %v252_v22  ;;  %v314_v30 = vrot.slane %v252_v22, 1  ;;  %v363_v32 = vrot.slane %v252_v22, 2 }
 0x127   :  { %406 = vst.msk [vmem:[#allocation2] sm:$0x1] %vm56_vm1, %v668_v14  ;;  %v184_v24 = vpop.f32.mrf.mxu3 }
 0x128   :  { %v189_v25 = vadd.f32 %v184_v24, %v139_v23 }
 0x12a   :  { %v239_v27 = vadd.f32 %v234_v26, %v189_v25 }
 0x12c   :  { %v242_v28 = vmax.f32 %v239_v27, 0.0 }
 0x12d   :  { %v253_v29 = vld [vmem:[#allocation2 + $0x8] sm:$0xff] }
 0x12e   :  { %251 = vst.msk [vmem:[#allocation2 + $0x11] sm:$0x3] %vm250_vm6, %v242_v28  ;;  %605 = vmatmul.msk.f32.gmra.mxu1 %vm59_vm2, %v253_v29  ;;  %v315_v31 = vrot.slane %v253_v29, 1  ;;  %v364_v33 = vrot.slane %v253_v29, 2 }
 0x12f   :  { %407 = vst.msk [vmem:[#allocation2 + $0x9] sm:$0x1] %vm56_vm1, %v668_v14 }
 0x130   :  { %409 = vst.msk [vmem:[#allocation2 + $0xa] sm:$0x1] %vm56_vm1, %v668_v14  ;;  %v316_v34 = vsel %vm149_vm4, %v314_v30, %v315_v31  ;;  %v365_v35 = vsel %vm199_vm3, %v363_v32, %v364_v33 }
 0x131   :  { %615 = vmatmul.msk.f32.vlgmr.msrb.gmra.mxu2 %vm59_vm2, %v316_v34  ;;  %626 = vmatmul.msk.f32.vlgmr.msra.gmra.mxu3 %vm59_vm2, %v365_v35 }
 0x135   :  { %v254_v36 = vld [vmem:[#allocation2 + $0x10] sm:$0xf] }
 0x136   :  { %606 = vmatmul.msk.f32.gmra.mxu1 %vm59_vm2, %v254_v36  ;;  %410 = vst.msk [vmem:[#allocation2 + $0x13] sm:$0x1] %vm56_vm1, %v668_v14  ;;  %v317_v37 = vrot.slane %v254_v36, 1  ;;  %v366_v38 = vrot.slane %v254_v36, 2  ;;  %v426_v14 = vld [vmem:[%s1044_s4 + $0x30] sm:$0xff] }
 0x137   :  { %446 = vmatpush.msra.mxu0 %v426_v14 }
 0x138   :  { %v318_v39 = vsel %vm149_vm4, %v315_v31, %v317_v37  ;;  %v367_v40 = vsel %vm199_vm3, %v364_v33, %v366_v38 }
 0x139   :  { %616 = vmatmul.msk.f32.gmra.mxu2 %vm59_vm2, %v318_v39  ;;  %627 = vmatmul.msk.f32.gmra.mxu3 %vm59_vm2, %v367_v40 }
 0x13a   :  { %447 = vmatpush.msra.mxu0 %v425_v42 }
 0x13c   :  { %448 = vmatpush.msra.mxu0 %v424_v43 }
 0x13e   :  { %449 = vmatpush.msra.mxu0 %v423_v47 }
 0x140   :  { %450 = vmatpush.msra.mxu0 %v422_v48 }
 0x141   :  { %617 = vmatmul.msk.f32.gmra.mxu2 %vm59_vm2, %v317_v37  ;;  %628 = vmatmul.msk.f32.gmra.mxu3 %vm59_vm2, %v366_v38  ;;  %v667_v37 = vld [vmem:[%s1043_s7] ss:$0 sm:$0xff] }
 0x142   :  { %451 = vmatpush.msra.mxu0 %v421_v49 }
 0x144   :  { %452 = vmatpush.msra.mxu0 %v420_v51 }
 0x1a3   :  { %v293_v63 = vpop.f32.mrf.mxu1 }
 0x1a4   :  { %v302_v2 = vadd.f32 %v666_v1, %v293_v63 }
 0x1ab   :  { %v296_v6 = vpop.f32.mrf.mxu1 }
 0x1ac   :  { %v303_v9 = vadd.f32 %v666_v1, %v296_v6 }
 0x1b3   :  { %v299_v15 = vpop.f32.mrf.mxu1 }
 0x1b4   :  { %v342_v3 = vpop.f32.mrf.mxu2  ;;  %v391_v4 = vpop.f32.mrf.mxu3  ;;  %v304_v18 = vadd.f32 %v666_v1, %v299_v15 }
 0x1b5   :  { %v351_v5 = vadd.f32 %v342_v3, %v302_v2 }
 0x1b7   :  { %v400_v7 = vadd.f32 %v391_v4, %v351_v5 }
 0x1b9   :  { %v403_v8 = vmax.f32 %v400_v7, 0.0 }
 0x1bb   :  { %408 = vst.msk [vmem:[#allocation2 + $0x1] sm:$0xff] %vm59_vm2, %v403_v8 }
 0x1bc   :  { %v345_v10 = vpop.f32.mrf.mxu2  ;;  %v394_v11 = vpop.f32.mrf.mxu3 }
 0x1bd   :  { %v352_v12 = vadd.f32 %v345_v10, %v303_v9 }
 0x1bf   :  { %v401_v13 = vadd.f32 %v394_v11, %v352_v12 }
 0x1c1   :  { %v404_v16 = vmax.f32 %v401_v13, 0.0 }
 0x1c2   :  { %v413_v17 = vld [vmem:[#allocation2] sm:$0xff] }
 0x1c3   :  { %411 = vst.msk [vmem:[#allocation2 + $0x9] sm:$0xfc] %vm248_vm5, %v404_v16  ;;  %629 = vmatmul.msk.f32.vlgmr.msra.gmra.mxu0 %vm59_vm2, %v413_v17  ;;  %v475_v25 = vrot.slane %v413_v17, 1  ;;  %v524_v26 = vrot.slane %v413_v17, 2 }
 0x1c4   :  { %v348_v19 = vpop.f32.mrf.mxu2  ;;  %v397_v21 = vpop.f32.mrf.mxu3 }
 0x1c5   :  { %v353_v20 = vadd.f32 %v348_v19, %v304_v18 }
 0x1c7   :  { %v402_v22 = vadd.f32 %v397_v21, %v353_v20 }
 0x1c9   :  { %v405_v23 = vmax.f32 %v402_v22, 0.0 }
 0x1ca   :  { %v414_v24 = vld [vmem:[#allocation2 + $0x8] sm:$0xff] }
 0x1cb   :  { %412 = vst.msk [vmem:[#allocation2 + $0x11] sm:$0x3] %vm250_vm6, %v405_v23  ;;  %630 = vmatmul.msk.f32.gmra.mxu0 %vm59_vm2, %v414_v24  ;;  %v476_v27 = vrot.slane %v414_v24, 1  ;;  %v525_v28 = vrot.slane %v414_v24, 2 }
 0x1cd   :  { %v477_v29 = vsel %vm149_vm4, %v475_v25, %v476_v27  ;;  %v526_v30 = vsel %vm199_vm3, %v524_v26, %v525_v28 }
 0x1ce   :  { %640 = vmatmul.msk.f32.vlgmr.msra.gmra.mxu1 %vm59_vm2, %v477_v29  ;;  %651 = vmatmul.msk.f32.vlgmr.msra.gmra.mxu2 %vm59_vm2, %v526_v30 }
 0x1d2   :  { %v415_v31 = vld [vmem:[#allocation2 + $0x10] sm:$0xf] }
 0x1d3   :  { %631 = vmatmul.msk.f32.gmra.mxu0 %vm59_vm2, %v415_v31  ;;  %v478_v32 = vrot.slane %v415_v31, 1  ;;  %v527_v33 = vrot.slane %v415_v31, 2 }
 0x1d5   :  { %v479_v34 = vsel %vm149_vm4, %v476_v27, %v478_v32  ;;  %v528_v35 = vsel %vm199_vm3, %v525_v28, %v527_v33 }
 0x1d6   :  { %641 = vmatmul.msk.f32.gmra.mxu1 %vm59_vm2, %v479_v34  ;;  %652 = vmatmul.msk.f32.gmra.mxu2 %vm59_vm2, %v528_v35 }
 0x1de   :  { %642 = vmatmul.msk.f32.gmra.mxu1 %vm59_vm2, %v478_v32  ;;  %653 = vmatmul.msk.f32.gmra.mxu2 %vm59_vm2, %v527_v33 }
 0x240   :  { %v454_v36 = vpop.f32.mrf.mxu0 }
 0x241   :  { %v463_v39 = vadd.f32 %v667_v37, %v454_v36 }
 0x248   :  { %v457_v41 = vpop.f32.mrf.mxu0 }
 0x249   :  { %v464_v45 = vadd.f32 %v667_v37, %v457_v41 }
 0x24b   :  { %v503_v38 = vpop.f32.mrf.mxu1 }
 0x24c   :  { %v512_v40 = vadd.f32 %v503_v38, %v463_v39 }
 0x250   :  { %v460_v49 = vpop.f32.mrf.mxu0 }
 0x251   :  { %v552_v14 = vpop.f32.mrf.mxu2  ;;  %v465_v52 = vadd.f32 %v667_v37, %v460_v49 }
 0x252   :  { %v561_v42 = vadd.f32 %v552_v14, %v512_v40 }
 0x253   :  { %v506_v43 = vpop.f32.mrf.mxu1 }
 0x254   :  { %v564_v44 = vmax.f32 %v561_v42, 0.0  ;;  %v513_v46 = vadd.f32 %v506_v43, %v464_v45 }
 0x256   :  { %567 = vst.msk [vmem:[%s1045_s8] sm:$0xff] %vm59_vm2, %v564_v44 }
 0x259   :  { %v555_v47 = vpop.f32.mrf.mxu2 }
 0x25a   :  { %v562_v48 = vadd.f32 %v555_v47, %v513_v46 }
 0x25b   :  { %v509_v51 = vpop.f32.mrf.mxu1 }
 0x25c   :  { %v565_v50 = vmax.f32 %v562_v48, 0.0  ;;  %v514_v53 = vadd.f32 %v509_v51, %v465_v52 }
 0x25e   :  { %654 = vst.msk [vmem:[%s1045_s8 + $0x6] sm:$0xfc] %vm248_vm5, %v565_v50 }
 0x261   :  { %v558_v54 = vpop.f32.mrf.mxu2 }
 0x262   :  { %v563_v55 = vadd.f32 %v558_v54, %v514_v53 }
 0x264   :  { %v566_v56 = vmax.f32 %v563_v55, 0.0 }
 0x266   :  { %655 = vst.msk [vmem:[%s1045_s8 + $0xe] sm:$0x3] %vm250_vm6, %v566_v56 }

</bundles_post_ra>
